<compile_context>
chip_gen: v7x
topology: tpu7x:2x2x1
jax: 0.10.0
libtpu: 0.0.40
codegen_flags: <defaults>
</compile_context>

<pallas_src>
import functools

import jax
import jax.numpy as jnp
import numpy as np
from jax.experimental import pallas as pl
from jax.experimental.pallas import tpu as pltpu

CIN, COUT, K = 6, 20, 4
REPL_PAD = 3               # F.pad(..., mode='replicate') amount
CONV_PAD = 1               # ConvTranspose2d padding
ZPAD = K - 1 - CONV_PAD    # equivalent direct-conv zero padding = 2


def _conv_gelu_kernel(xa_ref, xb_ref, w_ref, b_ref, o_ref, *, offsets, sub):
    """One (image n, row-tile rt) grid step.

    xa_ref: current TILE_R lane-tile of the flattened padded input, (1, CIN, TILE_R) bf16.
    xb_ref: first OVL_PAD lanes of the NEXT tile (overlap only), (1, CIN, OVL_PAD) bf16.
    w_ref : (COUT, K*K*CIN) = (20, 96) bf16 flattened flipped taps (resident).
    b_ref : (COUT, 1) f32 bias (resident).
    o_ref : (1, COUT, TILE_R) bf16 output tile (lane-dense store).
    """
    tile_r = o_ref.shape[-1]
    w = w_ref[...]                                   # (COUT, 96) bf16
    b = b_ref[...]                                   # (COUT, 1)  f32
    # ReLU commutes with replicate/zero padding -> fused here, once per window.
    win = jnp.maximum(jnp.concatenate([xa_ref[0], xb_ref[0]], axis=-1), 0)  # (CIN, TILE_R+OVL_PAD)

    # Unrolled static loop over 512-lane sub-chunks (bounds vreg pressure while
    # keeping the big BlockSpec tile / few grid steps).
    for s in range(tile_r // sub):
        base = s * sub
        # im2col stacked along sublanes: rows ordered tap-major, channel-minor.
        cols = jnp.concatenate(
            [win[:, base + off: base + off + sub] for off in offsets], axis=0)   # (96, sub) bf16
        # Single fused K=96 MXU matmul (accumulation happens inside the MXU).
        v3 = jnp.dot(w, cols, preferred_element_type=jnp.float32) + b            # (COUT, sub) f32
        # exact elementwise op sequence of the torch module (tanh-GELU style), f32
        v4 = v3 * 0.5
        v7 = v3 + (v3 * v3 * v3) * 0.044715
        v9 = jnp.tanh(v7 * 0.7978845608028654)
        o_ref[0, :, pl.ds(base, sub)] = (v4 * (v9 + 1.0)).astype(o_ref.dtype)


def model_forward(x, w, b):
    """x: (N, CIN, H, W) f32 NCHW; w: (CIN, COUT, K, K) torch ConvT layout; b: (COUT,)."""
    N, _, H, W = x.shape
    # padding glue (replicate then zero), done in bf16 to halve wrapper traffic
    xb16 = x.astype(jnp.bfloat16)
    xp = jnp.pad(xb16, ((0, 0), (0, 0), (REPL_PAD,) * 2, (REPL_PAD,) * 2), mode="edge")
    xz = jnp.pad(xp, ((0, 0), (0, 0), (ZPAD,) * 2, (ZPAD,) * 2))
    Hp, Wp = xz.shape[2], xz.shape[3]
    Ho, Wo = Hp - (K - 1), Wp - (K - 1)

    # Flatten spatial row-major.  out[o, ho*Wp+wo] = W_flat @ im2col(X)[:, r];
    # "junk" columns wo in [Wo, Wp) are computed and sliced off afterwards.
    ovl = (K - 1) * Wp + (K - 1)                         # max lane shift = 3*Wp + 3
    ovl_pad = max(128, pl.next_power_of_2(ovl))          # overlap fetch width (lanes)
    r_out = Ho * Wp
    # big power-of-two lane tile (<= 2048); power-of-two => divisible by ovl_pad
    tile_r = max(ovl_pad, min(2048, pl.next_power_of_2(max(r_out, 512))))
    sub = min(512, tile_r)                               # in-kernel sub-chunk
    n_rt = pl.cdiv(r_out, tile_r)
    r_out_pad = n_rt * tile_r
    r_in_pad = r_out_pad + ovl_pad                       # room for the last overlap fetch
    assert ovl <= ovl_pad <= tile_r and tile_r % ovl_pad == 0 and tile_r % sub == 0
    assert r_in_pad >= Hp * Wp

    xflat = jnp.pad(xz.reshape(N, CIN, Hp * Wp),
                    ((0, 0), (0, 0), (0, r_in_pad - Hp * Wp)))

    # flipped-kernel taps flattened to one lane-dense (COUT, K*K*CIN) bf16 matrix,
    # column order = tap-major, channel-minor (matches the in-kernel im2col stack).
    w_taps = jnp.transpose(w[:, :, ::-1, ::-1], (2, 3, 1, 0)).reshape(K * K, COUT, CIN)
    w_flat = jnp.transpose(w_taps, (1, 0, 2)).reshape(COUT, K * K * CIN).astype(jnp.bfloat16)
    b_col = b.reshape(COUT, 1).astype(jnp.float32)

    offsets = tuple(kh * Wp + kw for kh in range(K) for kw in range(K))
    xb_scale = tile_r // ovl_pad                         # blocked index scaling for overlap

    out_flat = pl.pallas_call(
        functools.partial(_conv_gelu_kernel, offsets=offsets, sub=sub),
        grid=(N, n_rt),
        in_specs=[
            pl.BlockSpec((1, CIN, tile_r), lambda n, r: (n, 0, r)),                      # current tile
            pl.BlockSpec((1, CIN, ovl_pad), lambda n, r: (n, 0, (r + 1) * xb_scale)),    # overlap only
            pl.BlockSpec((COUT, K * K * CIN), lambda n, r: (0, 0)),                      # resident weights
            pl.BlockSpec((COUT, 1), lambda n, r: (0, 0)),                                # resident bias
        ],
        out_specs=pl.BlockSpec((1, COUT, tile_r), lambda n, r: (n, 0, r)),
        out_shape=jax.ShapeDtypeStruct((N, COUT, r_out_pad), jnp.bfloat16),
        compiler_params=pltpu.CompilerParams(
            dimension_semantics=("parallel", "parallel"),
            vmem_limit_bytes=32 * 1024 * 1024,
        ),
    )(xflat, xflat, w_flat, b_col)

    # already N, C, (H*Wp): drop padded rows and the junk wo >= Wo columns; back to f32
    out = out_flat[:, :, :r_out].reshape(N, COUT, Ho, Wp)[:, :, :, :Wo]
    return out.astype(jnp.float32)


def reference_forward(x, w, b):
    """Pure-JAX f32 reference (XLA conv) used only for a numerical sanity check."""
    v1 = jnp.maximum(x, 0.0)
    v2 = jnp.pad(v1, ((0, 0), (0, 0), (REPL_PAD,) * 2, (REPL_PAD,) * 2), mode="edge")
    w_oihw = jnp.transpose(w[:, :, ::-1, ::-1], (1, 0, 2, 3))
    v3 = jax.lax.conv_general_dilated(
        v2, w_oihw, window_strides=(1, 1),
        padding=((ZPAD, ZPAD), (ZPAD, ZPAD)),
        dimension_numbers=("NCHW", "OIHW", "NCHW"),
    ) + b[None, :, None, None]
    v4 = v3 * 0.5
    v7 = v3 + v3 * v3 * v3 * 0.044715
    v9 = jnp.tanh(v7 * 0.7978845608028654)
    return v4 * (v9 + 1.0)


if __name__ == "__main__":
    key = jax.random.PRNGKey(0)
    kx, kw, kb = jax.random.split(key, 3)

    # small shapes consistent with the module (Cin fixed to 6 by the ConvTranspose2d)
    N, H, W = 2, 32, 16
    x = jax.random.normal(kx, (N, CIN, H, W), dtype=jnp.float32)

    # deterministic ConvTranspose2d parameters (uniform in PyTorch's default range)
    bound = 1.0 / np.sqrt(COUT * K * K)
    w = jax.random.uniform(kw, (CIN, COUT, K, K), jnp.float32, -bound, bound)
    b = jax.random.uniform(kb, (COUT,), jnp.float32, -bound, bound)

    out = jax.block_until_ready(model_forward(x, w, b))
    ref = jax.block_until_ready(reference_forward(x, w, b))

    assert out.shape == (N, COUT, H + 7, W + 7), out.shape
    # bf16 matmul operands + bf16 output store (per perf guidance) -> loose tolerance
    np.testing.assert_allclose(np.asarray(out), np.asarray(ref), rtol=2e-2, atol=2e-2)
    print("KERNEL_OK")
</pallas_src>

<mosaic_0001>
module attributes {stable_mosaic.version = 11 : i64} {
  func.func @_conv_gelu_kernel(%arg0: i32, %arg1: i32, %arg2: memref<1x6x1024xbf16, #tpu.memory_space<vmem>>, %arg3: memref<1x6x128xbf16, #tpu.memory_space<vmem>>, %arg4: memref<20x96xbf16, #tpu.memory_space<vmem>>, %arg5: memref<20x1xf32, #tpu.memory_space<vmem>>, %arg6: memref<1x20x1024xbf16, #tpu.memory_space<vmem>>) attributes {dimension_semantics = [#tpu.dimension_semantics<parallel>, #tpu.dimension_semantics<parallel>], iteration_bounds = array<i64: 2, 1>, scalar_prefetch = 0 : i64, scratch_operands = 0 : i64, tpu.core_type = #tpu.core_type<tc>, window_params = [{transform_indices = @transform_0, window_bounds = array<i64: 1, 6, 1024>}, {transform_indices = @transform_1, window_bounds = array<i64: 1, 6, 128>}, {pipeline_mode = #tpu.pipeline_mode<synchronous>, transform_indices = @transform_2, window_bounds = array<i64: 20, 96>}, {pipeline_mode = #tpu.pipeline_mode<synchronous>, transform_indices = @transform_3, window_bounds = array<i64: 20, 1>}, {transform_indices = @transform_4, window_bounds = array<i64: 1, 20, 1024>}]} {
    %c0 = arith.constant 0 : index
    %c0_0 = arith.constant 0 : index
    %0 = vector.load %arg4[%c0, %c0_0] : memref<20x96xbf16, #tpu.memory_space<vmem>>, vector<20x96xbf16>
    %c0_1 = arith.constant 0 : index
    %c0_2 = arith.constant 0 : index
    %1 = vector.load %arg5[%c0_1, %c0_2] : memref<20x1xf32, #tpu.memory_space<vmem>>, vector<20x1xf32>
    %c0_3 = arith.constant 0 : index
    %c0_4 = arith.constant 0 : index
    %c0_5 = arith.constant 0 : index
    %2 = vector.load %arg2[%c0_3, %c0_4, %c0_5] : memref<1x6x1024xbf16, #tpu.memory_space<vmem>>, vector<1x6x1024xbf16>
    %3 = vector.shape_cast %2 : vector<1x6x1024xbf16> to vector<6x1024xbf16>
    %c0_6 = arith.constant 0 : index
    %c0_7 = arith.constant 0 : index
    %c0_8 = arith.constant 0 : index
    %4 = vector.load %arg3[%c0_6, %c0_7, %c0_8] : memref<1x6x128xbf16, #tpu.memory_space<vmem>>, vector<1x6x128xbf16>
    %5 = vector.shape_cast %4 : vector<1x6x128xbf16> to vector<6x128xbf16>
    %6 = tpu.concatenate %3, %5 in 1 : vector<6x1024xbf16>, vector<6x128xbf16> -> vector<6x1152xbf16>
    %cst = arith.constant 0.000000e+00 : bf16
    %7 = vector.broadcast %cst : bf16 to vector<6x1152xbf16>
    %8 = arith.maximumf %6, %7 : vector<6x1152xbf16>
    %9 = vector.extract_strided_slice %8 {offsets = [0, 0], sizes = [6, 512], strides = [1, 1]} : vector<6x1152xbf16> to vector<6x512xbf16>
    %10 = vector.extract_strided_slice %8 {offsets = [0, 1], sizes = [6, 512], strides = [1, 1]} : vector<6x1152xbf16> to vector<6x512xbf16>
    %11 = vector.extract_strided_slice %8 {offsets = [0, 2], sizes = [6, 512], strides = [1, 1]} : vector<6x1152xbf16> to vector<6x512xbf16>
    %12 = vector.extract_strided_slice %8 {offsets = [0, 3], sizes = [6, 512], strides = [1, 1]} : vector<6x1152xbf16> to vector<6x512xbf16>
    %13 = vector.extract_strided_slice %8 {offsets = [0, 26], sizes = [6, 512], strides = [1, 1]} : vector<6x1152xbf16> to vector<6x512xbf16>
    %14 = vector.extract_strided_slice %8 {offsets = [0, 27], sizes = [6, 512], strides = [1, 1]} : vector<6x1152xbf16> to vector<6x512xbf16>
    %15 = vector.extract_strided_slice %8 {offsets = [0, 28], sizes = [6, 512], strides = [1, 1]} : vector<6x1152xbf16> to vector<6x512xbf16>
    %16 = vector.extract_strided_slice %8 {offsets = [0, 29], sizes = [6, 512], strides = [1, 1]} : vector<6x1152xbf16> to vector<6x512xbf16>
    %17 = vector.extract_strided_slice %8 {offsets = [0, 52], sizes = [6, 512], strides = [1, 1]} : vector<6x1152xbf16> to vector<6x512xbf16>
    %18 = vector.extract_strided_slice %8 {offsets = [0, 53], sizes = [6, 512], strides = [1, 1]} : vector<6x1152xbf16> to vector<6x512xbf16>
    %19 = vector.extract_strided_slice %8 {offsets = [0, 54], sizes = [6, 512], strides = [1, 1]} : vector<6x1152xbf16> to vector<6x512xbf16>
    %20 = vector.extract_strided_slice %8 {offsets = [0, 55], sizes = [6, 512], strides = [1, 1]} : vector<6x1152xbf16> to vector<6x512xbf16>
    %21 = vector.extract_strided_slice %8 {offsets = [0, 78], sizes = [6, 512], strides = [1, 1]} : vector<6x1152xbf16> to vector<6x512xbf16>
    %22 = vector.extract_strided_slice %8 {offsets = [0, 79], sizes = [6, 512], strides = [1, 1]} : vector<6x1152xbf16> to vector<6x512xbf16>
    %23 = vector.extract_strided_slice %8 {offsets = [0, 80], sizes = [6, 512], strides = [1, 1]} : vector<6x1152xbf16> to vector<6x512xbf16>
    %24 = vector.extract_strided_slice %8 {offsets = [0, 81], sizes = [6, 512], strides = [1, 1]} : vector<6x1152xbf16> to vector<6x512xbf16>
    %25 = tpu.concatenate %9, %10, %11, %12, %13, %14, %15, %16, %17, %18, %19, %20, %21, %22, %23, %24 in 0 : vector<6x512xbf16>, vector<6x512xbf16>, vector<6x512xbf16>, vector<6x512xbf16>, vector<6x512xbf16>, vector<6x512xbf16>, vector<6x512xbf16>, vector<6x512xbf16>, vector<6x512xbf16>, vector<6x512xbf16>, vector<6x512xbf16>, vector<6x512xbf16>, vector<6x512xbf16>, vector<6x512xbf16>, vector<6x512xbf16>, vector<6x512xbf16> -> vector<96x512xbf16>
    %cst_9 = arith.constant dense<0.000000e+00> : vector<20x512xf32>
    %26 = tpu.matmul %0, %25, %cst_9 {dimension_numbers = #tpu.dot_dimension_numbers<[1], [0], [0], [1], [0, 0, 1, 1], [], []>} : vector<20x96xbf16>, vector<96x512xbf16>, vector<20x512xf32> -> vector<20x512xf32>
    %27 = vector.broadcast %1 : vector<20x1xf32> to vector<20x512xf32>
    %28 = arith.addf %26, %27 : vector<20x512xf32>
    %cst_10 = arith.constant 5.000000e-01 : f32
    %29 = vector.broadcast %cst_10 : f32 to vector<20x512xf32>
    %30 = arith.mulf %28, %29 : vector<20x512xf32>
    %31 = arith.mulf %28, %28 : vector<20x512xf32>
    %32 = arith.mulf %31, %28 : vector<20x512xf32>
    %cst_11 = arith.constant 4.471500e-02 : f32
    %33 = vector.broadcast %cst_11 : f32 to vector<20x512xf32>
    %34 = arith.mulf %32, %33 : vector<20x512xf32>
    %35 = arith.addf %28, %34 : vector<20x512xf32>
    %cst_12 = arith.constant 0.797884583 : f32
    %36 = vector.broadcast %cst_12 : f32 to vector<20x512xf32>
    %37 = arith.mulf %35, %36 : vector<20x512xf32>
    %38 = math.tanh %37 : vector<20x512xf32>
    %cst_13 = arith.constant 1.000000e+00 : f32
    %39 = vector.broadcast %cst_13 : f32 to vector<20x512xf32>
    %40 = arith.addf %38, %39 : vector<20x512xf32>
    %41 = arith.mulf %30, %40 : vector<20x512xf32>
    %42 = arith.truncf %41 : vector<20x512xf32> to vector<20x512xbf16>
    %c0_14 = arith.constant 0 : index
    %c0_15 = arith.constant 0 : index
    %c0_16 = arith.constant 0 : index
    %43 = vector.load %arg6[%c0_14, %c0_15, %c0_16] : memref<1x20x1024xbf16, #tpu.memory_space<vmem>>, vector<1x20x512xbf16>
    %44 = vector.shape_cast %43 : vector<1x20x512xbf16> to vector<20x512xbf16>
    %45 = vector.shape_cast %42 : vector<20x512xbf16> to vector<1x20x512xbf16>
    tpu.vector_store %arg6[%c0_14, %c0_15, %c0_16], %45 {strides = array<i32>} : memref<1x20x1024xbf16, #tpu.memory_space<vmem>>, vector<1x20x512xbf16>,
    %46 = vector.extract_strided_slice %8 {offsets = [0, 512], sizes = [6, 512], strides = [1, 1]} : vector<6x1152xbf16> to vector<6x512xbf16>
    %47 = vector.extract_strided_slice %8 {offsets = [0, 513], sizes = [6, 512], strides = [1, 1]} : vector<6x1152xbf16> to vector<6x512xbf16>
    %48 = vector.extract_strided_slice %8 {offsets = [0, 514], sizes = [6, 512], strides = [1, 1]} : vector<6x1152xbf16> to vector<6x512xbf16>
    %49 = vector.extract_strided_slice %8 {offsets = [0, 515], sizes = [6, 512], strides = [1, 1]} : vector<6x1152xbf16> to vector<6x512xbf16>
    %50 = vector.extract_strided_slice %8 {offsets = [0, 538], sizes = [6, 512], strides = [1, 1]} : vector<6x1152xbf16> to vector<6x512xbf16>
    %51 = vector.extract_strided_slice %8 {offsets = [0, 539], sizes = [6, 512], strides = [1, 1]} : vector<6x1152xbf16> to vector<6x512xbf16>
    %52 = vector.extract_strided_slice %8 {offsets = [0, 540], sizes = [6, 512], strides = [1, 1]} : vector<6x1152xbf16> to vector<6x512xbf16>
    %53 = vector.extract_strided_slice %8 {offsets = [0, 541], sizes = [6, 512], strides = [1, 1]} : vector<6x1152xbf16> to vector<6x512xbf16>
    %54 = vector.extract_strided_slice %8 {offsets = [0, 564], sizes = [6, 512], strides = [1, 1]} : vector<6x1152xbf16> to vector<6x512xbf16>
    %55 = vector.extract_strided_slice %8 {offsets = [0, 565], sizes = [6, 512], strides = [1, 1]} : vector<6x1152xbf16> to vector<6x512xbf16>
    %56 = vector.extract_strided_slice %8 {offsets = [0, 566], sizes = [6, 512], strides = [1, 1]} : vector<6x1152xbf16> to vector<6x512xbf16>
    %57 = vector.extract_strided_slice %8 {offsets = [0, 567], sizes = [6, 512], strides = [1, 1]} : vector<6x1152xbf16> to vector<6x512xbf16>
    %58 = vector.extract_strided_slice %8 {offsets = [0, 590], sizes = [6, 512], strides = [1, 1]} : vector<6x1152xbf16> to vector<6x512xbf16>
    %59 = vector.extract_strided_slice %8 {offsets = [0, 591], sizes = [6, 512], strides = [1, 1]} : vector<6x1152xbf16> to vector<6x512xbf16>
    %60 = vector.extract_strided_slice %8 {offsets = [0, 592], sizes = [6, 512], strides = [1, 1]} : vector<6x1152xbf16> to vector<6x512xbf16>
    %61 = vector.extract_strided_slice %8 {offsets = [0, 593], sizes = [6, 512], strides = [1, 1]} : vector<6x1152xbf16> to vector<6x512xbf16>
    %62 = tpu.concatenate %46, %47, %48, %49, %50, %51, %52, %53, %54, %55, %56, %57, %58, %59, %60, %61 in 0 : vector<6x512xbf16>, vector<6x512xbf16>, vector<6x512xbf16>, vector<6x512xbf16>, vector<6x512xbf16>, vector<6x512xbf16>, vector<6x512xbf16>, vector<6x512xbf16>, vector<6x512xbf16>, vector<6x512xbf16>, vector<6x512xbf16>, vector<6x512xbf16>, vector<6x512xbf16>, vector<6x512xbf16>, vector<6x512xbf16>, vector<6x512xbf16> -> vector<96x512xbf16>
    %cst_17 = arith.constant dense<0.000000e+00> : vector<20x512xf32>
    %63 = tpu.matmul %0, %62, %cst_17 {dimension_numbers = #tpu.dot_dimension_numbers<[1], [0], [0], [1], [0, 0, 1, 1], [], []>} : vector<20x96xbf16>, vector<96x512xbf16>, vector<20x512xf32> -> vector<20x512xf32>
    %64 = vector.broadcast %1 : vector<20x1xf32> to vector<20x512xf32>
    %65 = arith.addf %63, %64 : vector<20x512xf32>
    %cst_18 = arith.constant 5.000000e-01 : f32
    %66 = vector.broadcast %cst_18 : f32 to vector<20x512xf32>
    %67 = arith.mulf %65, %66 : vector<20x512xf32>
    %68 = arith.mulf %65, %65 : vector<20x512xf32>
    %69 = arith.mulf %68, %65 : vector<20x512xf32>
    %cst_19 = arith.constant 4.471500e-02 : f32
    %70 = vector.broadcast %cst_19 : f32 to vector<20x512xf32>
    %71 = arith.mulf %69, %70 : vector<20x512xf32>
    %72 = arith.addf %65, %71 : vector<20x512xf32>
    %cst_20 = arith.constant 0.797884583 : f32
    %73 = vector.broadcast %cst_20 : f32 to vector<20x512xf32>
    %74 = arith.mulf %72, %73 : vector<20x512xf32>
    %75 = math.tanh %74 : vector<20x512xf32>
    %cst_21 = arith.constant 1.000000e+00 : f32
    %76 = vector.broadcast %cst_21 : f32 to vector<20x512xf32>
    %77 = arith.addf %75, %76 : vector<20x512xf32>
    %78 = arith.mulf %67, %77 : vector<20x512xf32>
    %79 = arith.truncf %78 : vector<20x512xf32> to vector<20x512xbf16>
    %c0_22 = arith.constant 0 : index
    %c0_23 = arith.constant 0 : index
    %c512 = arith.constant 512 : index
    %80 = vector.load %arg6[%c0_22, %c0_23, %c512] : memref<1x20x1024xbf16, #tpu.memory_space<vmem>>, vector<1x20x512xbf16>
    %81 = vector.shape_cast %80 : vector<1x20x512xbf16> to vector<20x512xbf16>
    %82 = vector.shape_cast %79 : vector<20x512xbf16> to vector<1x20x512xbf16>
    tpu.vector_store %arg6[%c0_22, %c0_23, %c512], %82 {strides = array<i32>} : memref<1x20x1024xbf16, #tpu.memory_space<vmem>>, vector<1x20x512xbf16>,
    return
  }
  func.func @transform_0(%arg0: i32, %arg1: i32) -> (i32, i32, i32) {
    %c0_i32 = arith.constant 0 : i32
    %c0_i32_0 = arith.constant 0 : i32
    return %arg0, %c0_i32, %arg1 : i32, i32, i32
  }
  func.func @transform_1(%arg0: i32, %arg1: i32) -> (i32, i32, i32) {
    %c1_i32 = arith.constant 1 : i32
    %0 = arith.addi %arg1, %c1_i32 : i32
    %c8_i32 = arith.constant 8 : i32
    %1 = arith.muli %0, %c8_i32 : i32
    %c0_i32 = arith.constant 0 : i32
    %c0_i32_0 = arith.constant 0 : i32
    return %arg0, %c0_i32, %1 : i32, i32, i32
  }
  func.func @transform_2(%arg0: i32, %arg1: i32) -> (i32, i32) {
    %c0_i32 = arith.constant 0 : i32
    %c0_i32_0 = arith.constant 0 : i32
    %c0_i32_1 = arith.constant 0 : i32
    return %c0_i32, %c0_i32_0 : i32, i32
  }
  func.func @transform_3(%arg0: i32, %arg1: i32) -> (i32, i32) {
    %c0_i32 = arith.constant 0 : i32
    %c0_i32_0 = arith.constant 0 : i32
    %c0_i32_1 = arith.constant 0 : i32
    return %c0_i32, %c0_i32_0 : i32, i32
  }
  func.func @transform_4(%arg0: i32, %arg1: i32) -> (i32, i32, i32) {
    %c0_i32 = arith.constant 0 : i32
    %c0_i32_0 = arith.constant 0 : i32
    return %arg0, %c0_i32, %arg1 : i32, i32, i32
  }
}

</mosaic_0001>

<bundles_post_ra>
// kernel: tpu_custom_call.1
= control target key start
LH: loop header
LB: loop body
LE: loop exit
PB: predicated region body
PF: predicated region fallthrough
CT: control target
= control target key end

     0   :  { %s1993_s15 = smov 0   ;;  %s1995_s16 = smov 0   ;;  %s3112_s0 = inlined_call_operand.vmem [shape: bf16[2,6,1152], index: 0, kind: input, shape index: {}]   ;;  %s3113_s1 = inlined_call_operand.vmem [shape: bf16[2,6,1152], index: 1, kind: input, shape index: {}]   ;;  %s3114_s2 = inlined_call_operand.vmem [shape: bf16[20,96], index: 2, kind: input, shape index: {}]   ;;  %s3115_s3 = inlined_call_operand.vmem [shape: f32[20,1], index: 3, kind: input, shape index: {}]   ;;  %s3116_s4 = inlined_call_operand.vmem [shape: bf16[2,20,1024], index: 4, kind: output, shape index: {}]  }
   0x1   :  { %s1997_s17 = smov 0  }
   0x2 LB: > { %s26_s18 = sadd.s32 1, %s1946_s16  ;;  %p1774_p0 = scmp.ge.s32.totalorder %s1950_s17, 1  ;;  %s1950_s17 = sphi %s1997_s17, %s14_s17   ;;  %s1946_s16 = sphi %s1995_s16, %s3152_s16   ;;  %s1942_s15 = sphi %s1993_s15, %s3151_s15  }
   0x3   : > { %p28_p1 = scmp.ge.s32.totalorder %s26_s18, 2  ;;  %p214_p2 = scmp.lt.s32.totalorder %s1950_s17, 3 }
   0x5   : > { %s3154_s18 = smov (%p28_p1, %s26_s18), 0  ;;  %p215_p3 = pnand %p1774_p0, %p214_p2 }
   0x6   : > { %p267_p4 = scmp.lt.s32.totalorder (!%p215_p3), %s1942_s15, 1  ;;  %v1952_v0 = vmov (!%p215_p3), 0   ;;  %s1953_s23 = smov (!%p215_p3), 127   ;;  %vm371_vm0 = vcmask (!%p215_p3), 1039360   ;;  %vm391_vm1 = vcmask (!%p215_p3), 1031168   ;;  %vm616_vm2 = vcmask (!%p215_p3), 1042432  }
   0x7   : > { %218 = sbr.rel (%p215_p3) target bundleno = 669 (0x29d), region = 36  ;;  %829 = vmatprep.mubr.bf16.mxu0 (!%p215_p3), %v1952_v0  ;;  %880 = vmatprep.mubr.bf16.mxu1 (!%p215_p3), %v1952_v0  ;;  %s1954_s24 = smov (!%p215_p3), 126   ;;  %vm629_vm3 = vcmask (!%p215_p3), 1045504   ;;  %vm411_vm4 = vcmask (!%p215_p3), 1022976   ;;  %vm431_vm5 = vcmask (!%p215_p3), 834560   ;;  %vm642_vm6 = vcmask (!%p215_p3), 1040384  }
   0x8   : > { %1869 = vset.pattern.permute.xlu0 (!%p215_p3), %v1952_v0  ;;  %1868 = vset.pattern.permute.xlu1 (!%p215_p3), %v1952_v0  ;;  %s1955_s25 = smov (!%p215_p3), 125   ;;  %s1956_s26 = smov (!%p215_p3), 102   ;;  %vm651_vm7 = vcmask (!%p215_p3), 1043456   ;;  %vm451_vm8 = vcmask (!%p215_p3), 826368   ;;  %vm660_vm9 = vcmask (!%p215_p3), 1046528   ;;  %vm471_vm10 = vcmask (!%p215_p3), 818176  }
   0x9   : > { %s1957_s27 = smov (!%p215_p3), 101   ;;  %s1958_s28 = smov (!%p215_p3), 100   ;;  %vm673_vm11 = vcmask (!%p215_p3), 1041408   ;;  %vm3117_vm12 = vcmask (!%p215_p3), 809984   ;;  %vm682_vm13 = vcmask (!%p215_p3), 1044480   ;;  %vm3121_vm14 = vcmask (!%p215_p3), 613376  }
   0xa   : > { %s1959_s29 = smov (!%p215_p3), 99   ;;  %s1960_s30 = smov (!%p215_p3), 76   ;;  %vm3120_vm15 = vcmask (!%p215_p3), 621568  }
   0xb   : > { %s1961_s5 = smov (!%p215_p3), 75   ;;  %s1962_s6 = smov (!%p215_p3), 74  }
   0xc   : > { %s1963_s7 = smov (!%p215_p3), 73   ;;  %s1964_s8 = smov (!%p215_p3), 50  }
   0xd   : > { %s1965_s9 = smov (!%p215_p3), 49   ;;  %s1966_s10 = smov (!%p215_p3), 48  }
   0xe   : > { %s3156_s15 = smov (!%p267_p4, %s1942_s15), 1  ;;  %s1967_s12 = smov 47  }
   0xf   : > { %s1824_s19 = smul.u32 36, %s3156_s15 }
  0x11   : > { %s2023_s22 = scalar_lea.vmem %s3112_s0, %s1824_s19  ;;  %s1811_s11 = sadd.s32 32, %s1824_s19 }
  0x12   : > { %v310_v1 = vld [vmem:[%s2023_s22 + $0x8] sm:$0x77]  ;;  %v309_v2 = vld [vmem:[%s2023_s22] sm:$0x77]  ;;  %v2028_v3 = vld [vmem:[%s2023_s22 + $0x10] sm:$0x77]  ;;  %s289_s19 = scalar_lea.vmem %s3113_s1, %s1811_s11 }
  0x13   : > { %v1781_v4 = vcombine.high %v310_v1, %v310_v1  ;;  %v1780_v5 = vcombine.low %v310_v1, %v310_v1  ;;  %v1779_v6 = vcombine.high %v309_v2, %v309_v2  ;;  %v1782_v7 = vcombine.low %v2028_v3, %v2028_v3 }
  0x14   : > { %v1778_v10 = vcombine.low %v309_v2, %v309_v2 }
  0x15   : > { %v2033_v8 = vmax.bf16 %v1952_v0, %v1781_v4  ;;  %v2036_v9 = vmax.bf16 %v1952_v0, %v1779_v6  ;;  %v2039_v11 = vmax.bf16 %v1952_v0, %v1780_v5  ;;  %v2042_v12 = vmax.bf16 %v1952_v0, %v1782_v7 }
  0x16   : > { %v2055_v17 = vmax.bf16 %v1952_v0, %v1778_v10 }
  0x17   : > { %v359_v13 = vrot.slane %v2033_v8, 5  ;;  %v357_v14 = vrot.slane %v2036_v9, 5  ;;  %v360_v15 = vrot.slane %v2042_v12, 5  ;;  %v358_v16 = vrot.slane %v2039_v11, 5 }
  0x18   : > { %v377_v18 = vrot.slane %v2036_v9, 2  ;;  %v356_v19 = vrot.slane %v2055_v17, 5  ;;  %v379_v20 = vrot.slane %v2033_v8, 2  ;;  %v378_v21 = vrot.slane %v2039_v11, 2 }
  0x19   : > { %367 = vrot.lane.b32.xlu1 %v359_v13, %s1953_s23  ;;  %363 = vrot.lane.b32.xlu0 %v357_v14, %s1953_s23  ;;  %v376_v22 = vrot.slane %v2055_v17, 2  ;;  %v380_v23 = vrot.slane %v2042_v12, 2  ;;  %v398_v24 = vrot.slane %v2039_v11, 7  ;;  %v397_v25 = vrot.slane %v2036_v9, 7 }
  0x1a   : > { %v400_v26 = vrot.slane %v2042_v12, 7  ;;  %v399_v27 = vrot.slane %v2033_v8, 7  ;;  %v417_v28 = vrot.slane %v2036_v9, 4  ;;  %v396_v29 = vrot.slane %v2055_v17, 7 }
  0x1b   : > { %v419_v30 = vrot.slane %v2033_v8, 4  ;;  %v418_v31 = vrot.slane %v2039_v11, 4  ;;  %v416_v32 = vrot.slane %v2055_v17, 4  ;;  %v420_v33 = vrot.slane %v2042_v12, 4 }
  0x1c   : > { %v438_v34 = vrot.slane %v2039_v11, 1  ;;  %v437_v35 = vrot.slane %v2036_v9, 1  ;;  %v440_v36 = vrot.slane %v2042_v12, 1  ;;  %v439_v37 = vrot.slane %v2033_v8, 1 }
  0x1d   : > { %369 = vrot.lane.b32.xlu1 %v360_v15, %s1953_s23  ;;  %365 = vrot.lane.b32.xlu0 %v358_v16, %s1953_s23  ;;  %v457_v38 = vrot.slane %v2036_v9, 6  ;;  %v436_v39 = vrot.slane %v2055_v17, 1  ;;  %v459_v40 = vrot.slane %v2033_v8, 6  ;;  %v458_v41 = vrot.slane %v2039_v11, 6 }
  0x1e   : > { %v456_v42 = vrot.slane %v2055_v17, 6  ;;  %v460_v43 = vrot.slane %v2042_v12, 6  ;;  %v478_v44 = vrot.slane %v2039_v11, 3  ;;  %v477_v45 = vrot.slane %v2036_v9, 3 }
  0x1f   : > { %v480_v46 = vrot.slane %v2042_v12, 3  ;;  %v479_v47 = vrot.slane %v2033_v8, 3  ;;  %v476_v48 = vrot.slane %v2055_v17, 3 }
  0x21   : > { %383 = vrot.lane.b32.xlu1 %v377_v18, %s1954_s24  ;;  %361 = vrot.lane.b32.xlu0 %v356_v19, %s1953_s23 }
  0x25   : > { %387 = vrot.lane.b32.xlu1 %v379_v20, %s1954_s24  ;;  %385 = vrot.lane.b32.xlu0 %v378_v21, %s1954_s24 }
  0x29   : > { %381 = vrot.lane.b32.xlu1 %v376_v22, %s1954_s24  ;;  %389 = vrot.lane.b32.xlu0 %v380_v23, %s1954_s24 }
  0x2d   : > { %405 = vrot.lane.b32.xlu1 %v398_v24, %s1955_s25  ;;  %403 = vrot.lane.b32.xlu0 %v397_v25, %s1955_s25 }
  0x31   : > { %409 = vrot.lane.b32.xlu1 %v400_v26, %s1955_s25  ;;  %407 = vrot.lane.b32.xlu0 %v399_v27, %s1955_s25 }
  0x35   : > { %423 = vrot.lane.b32.xlu1 %v417_v28, %s1956_s26  ;;  %401 = vrot.lane.b32.xlu0 %v396_v29, %s1955_s25 }
  0x39   : > { %427 = vrot.lane.b32.xlu1 %v419_v30, %s1956_s26  ;;  %425 = vrot.lane.b32.xlu0 %v418_v31, %s1956_s26 }
  0x3d   : > { %421 = vrot.lane.b32.xlu1 %v416_v32, %s1956_s26  ;;  %429 = vrot.lane.b32.xlu0 %v420_v33, %s1956_s26 }
  0x41   : > { %445 = vrot.lane.b32.xlu1 %v438_v34, %s1957_s27  ;;  %443 = vrot.lane.b32.xlu0 %v437_v35, %s1957_s27 }
  0x45   : > { %449 = vrot.lane.b32.xlu1 %v440_v36, %s1957_s27  ;;  %447 = vrot.lane.b32.xlu0 %v439_v37, %s1957_s27 }
  0x49   : > { %463 = vrot.lane.b32.xlu1 %v457_v38, %s1958_s28  ;;  %441 = vrot.lane.b32.xlu0 %v436_v39, %s1957_s27 }
  0x4d   : > { %467 = vrot.lane.b32.xlu1 %v459_v40, %s1958_s28  ;;  %465 = vrot.lane.b32.xlu0 %v458_v41, %s1958_s28 }
  0x51   : > { %461 = vrot.lane.b32.xlu1 %v456_v42, %s1958_s28  ;;  %469 = vrot.lane.b32.xlu0 %v460_v43, %s1958_s28 }
  0x55   : > { %485 = vrot.lane.b32.xlu1 %v478_v44, %s1959_s29  ;;  %483 = vrot.lane.b32.xlu0 %v477_v45, %s1959_s29 }
  0x59   : > { %489 = vrot.lane.b32.xlu1 %v480_v46, %s1959_s29  ;;  %487 = vrot.lane.b32.xlu0 %v479_v47, %s1959_s29 }
  0x5d   : > { %498 = vrot.lane.b32.xlu1 %v2036_v9, %s1960_s30  ;;  %481 = vrot.lane.b32.xlu0 %v476_v48, %s1959_s29 }
  0x61   : > { %502 = vrot.lane.b32.xlu1 %v2033_v8, %s1960_s30  ;;  %500 = vrot.lane.b32.xlu0 %v2039_v11, %s1960_s30 }
  0x65   : > { %513 = vrot.lane.b32.xlu1 %v357_v14, %s1961_s5  ;;  %504 = vrot.lane.b32.xlu0 %v2042_v12, %s1960_s30 }
  0x69   : > { %517 = vrot.lane.b32.xlu1 %v359_v13, %s1961_s5  ;;  %515 = vrot.lane.b32.xlu0 %v358_v16, %s1961_s5 }
  0x6d   : > { %496 = vrot.lane.b32.xlu1 %v2055_v17, %s1960_s30  ;;  %519 = vrot.lane.b32.xlu0 %v360_v15, %s1961_s5 }
  0x71   : > { %528 = vrot.lane.b32.xlu1 %v377_v18, %s1962_s6  ;;  %511 = vrot.lane.b32.xlu0 %v356_v19, %s1961_s5 }
  0x75   : > { %532 = vrot.lane.b32.xlu1 %v379_v20, %s1962_s6  ;;  %530 = vrot.lane.b32.xlu0 %v378_v21, %s1962_s6  ;;  %v1783_v20 = vcombine.high %v2028_v3, %v2028_v3  ;;  %v312_v21 = vld [vmem:[%s2023_s22 + $0x18] sm:$0x77] }
  0x76   : > { %v1784_v3 = vcombine.low %v312_v21, %v312_v21 }
  0x79   : > { %526 = vrot.lane.b32.xlu1 %v376_v22, %s1962_s6  ;;  %534 = vrot.lane.b32.xlu0 %v380_v23, %s1962_s6 }
  0x7d   : > { %545 = vrot.lane.b32.xlu1 %v398_v24, %s1963_s7  ;;  %543 = vrot.lane.b32.xlu0 %v397_v25, %s1963_s7  ;;  %v2339_v24 = vmax.bf16 %v1952_v0, %v1783_v20  ;;  %v1785_v25 = vcombine.high %v312_v21, %v312_v21 }
  0x7f   : > { %v1105_v20 = vrot.slane %v2339_v24, 4 }
  0x81   : > { %549 = vrot.lane.b32.xlu1 %v400_v26, %s1963_s7  ;;  %547 = vrot.lane.b32.xlu0 %v399_v27, %s1963_s7 }
  0x85   : > { %558 = vrot.lane.b32.xlu1 %v417_v28, %s1964_s8  ;;  %541 = vrot.lane.b32.xlu0 %v396_v29, %s1963_s7  ;;  %v2355_v28 = vmax.bf16 %v1952_v0, %v1784_v3  ;;  %v313_v29 = vld [vmem:[%s289_s19] sm:$0x7] }
  0x89   : > { %562 = vrot.lane.b32.xlu1 %v419_v30, %s1964_s8  ;;  %560 = vrot.lane.b32.xlu0 %v418_v31, %s1964_s8 }
  0x8b   : > { %v368_v49 = vpop.permute.xlu1 %367  ;;  %v364_v50 = vpop.permute.xlu0 %363 }
  0x8d   : > { %556 = vrot.lane.b32.xlu1 %v416_v32, %s1964_s8  ;;  %564 = vrot.lane.b32.xlu0 %v420_v33, %s1964_s8  ;;  %v1058_v32 = vrot.slane %v2355_v28, 5  ;;  %v2366_v33 = vmax.bf16 %v1952_v0, %v313_v29 }
  0x8f   : > { %v2257_v51 = vpop.permute.xlu1 %369  ;;  %v366_v52 = vpop.permute.xlu0 %365  ;;  %v1092_v21 = vrot.slane %v2366_v33, 7 }
  0x90   : > { %v373_v55 = vsel %vm371_vm0, %v364_v50, %v366_v52  ;;  %v375_v60 = vsel %vm371_vm0, %v368_v49, %v2257_v51  ;;  %v374_v63 = vsel %vm371_vm0, %v366_v52, %v368_v49 }
  0x91   : > { %575 = vrot.lane.b32.xlu1 %v438_v34, %s1965_s9  ;;  %573 = vrot.lane.b32.xlu0 %v437_v35, %s1965_s9  ;;  %v622_v59 = vsel %vm616_vm2, %v2036_v9, %v373_v55  ;;  %v628_v10 = vsel %vm616_vm2, %v2033_v8, %v375_v60  ;;  %v625_v15 = vsel %vm616_vm2, %v2039_v11, %v374_v63  ;;  %v1057_v9 = vrot.slane %v2339_v24, 5 }
  0x92   : > { %v2352_v11 = vmax.bf16 %v1952_v0, %v1785_v25 }
  0x93   : > { %v384_v53 = vpop.permute.xlu1 %383  ;;  %v362_v54 = vpop.permute.xlu0 %361 }
  0x94   : > { %v372_v61 = vsel %vm371_vm0, %v362_v54, %v364_v50  ;;  %v1059_v8 = vrot.slane %v2352_v11, 5  ;;  %v1074_v50 = vrot.slane %v2355_v28, 2 }
  0x95   : > { %579 = vrot.lane.b32.xlu1 %v440_v36, %s1965_s9  ;;  %577 = vrot.lane.b32.xlu0 %v439_v37, %s1965_s9  ;;  %v619_v6 = vsel %vm616_vm2, %v2055_v17, %v372_v61  ;;  %v1073_v17 = vrot.slane %v2339_v24, 2 }
  0x97   : > { %v388_v56 = vpop.permute.xlu1 %387  ;;  %v386_v57 = vpop.permute.xlu0 %385 }
  0x98   : > { %v2273_v58 = vsel %vm391_vm1, %v384_v53, %v386_v57  ;;  %v2292_v4 = vsel %vm391_vm1, %v386_v57, %v388_v56  ;;  %v1089_v57 = vrot.slane %v2339_v24, 7 }
  0x99   : > { %588 = vrot.lane.b32.xlu1 %v457_v38, %s1966_s10  ;;  %571 = vrot.lane.b32.xlu0 %v436_v39, %s1965_s9  ;;  %v634_v62 = vsel %vm629_vm3, %v622_v59, %v2273_v58  ;;  %v637_v16 = vsel %vm629_vm3, %v625_v15, %v2292_v4  ;;  %v1060_v38 = vrot.slane %v2366_v33, 5 }
  0x9a   : > { %797 = vmatprep.subr.bf16.mxu0 %v634_v62 }
  0x9b   : > { %v382_v1 = vpop.permute.xlu1 %381  ;;  %v2289_v2 = vpop.permute.xlu0 %389 }
  0x9c   : > { %v2295_v5 = vsel %vm391_vm1, %v382_v1, %v384_v53  ;;  %v2301_v7 = vsel %vm391_vm1, %v388_v56, %v2289_v2 }
  0x9d   : > { %592 = vrot.lane.b32.xlu1 %v459_v40, %s1966_s10  ;;  %590 = vrot.lane.b32.xlu0 %v458_v41, %s1966_s10  ;;  %v631_v13 = vsel %vm629_vm3, %v619_v6, %v2295_v5  ;;  %v640_v14 = vsel %vm629_vm3, %v628_v10, %v2301_v7 }
  0x9e   : > { %798 = vmatpush1.bf16.msra.mxu0 %v631_v13  ;;  %848 = vmatprep.subr.bf16.mxu1 %v640_v14 }
  0x9f   : > { %v406_v18 = vpop.permute.xlu1 %405  ;;  %849 = vmatpush1.bf16.msra.mxu1 %v637_v16  ;;  %v404_v19 = vpop.permute.xlu0 %403  ;;  %v1091_v16 = vrot.slane %v2352_v11, 7 }
  0xa0   : > { %v413_v36 = vsel %vm411_vm4, %v404_v19, %v406_v18 }
  0xa1   : > { %586 = vrot.lane.b32.xlu1 %v456_v42, %s1966_s10  ;;  %594 = vrot.lane.b32.xlu0 %v460_v43, %s1966_s10  ;;  %v646_v39 = vsel %vm642_vm6, %v2273_v58, %v413_v36  ;;  %v1075_v42 = vrot.slane %v2352_v11, 2  ;;  %v1121_v36 = vrot.slane %v2339_v24, 1 }
  0xa3   : > { %v2328_v22 = vpop.permute.xlu1 %409  ;;  %v408_v23 = vpop.permute.xlu0 %407 }
  0xa4   : > { %v414_v43 = vsel %vm411_vm4, %v406_v18, %v408_v23 }
  0xa5   : > { %605 = vrot.lane.b32.xlu1 %v478_v44, %s1967_s12  ;;  %603 = vrot.lane.b32.xlu0 %v477_v45, %s1967_s12  ;;  %v415_v44 = vsel %vm411_vm4, %v408_v23, %v2328_v22  ;;  %v648_v52 = vsel %vm642_vm6, %v2292_v4, %v414_v43  ;;  %v1076_v4 = vrot.slane %v2366_v33, 2 }
  0xa6   : > { %v650_v53 = vsel %vm642_vm6, %v2301_v7, %v415_v44 }
  0xa7   : > { %v424_v26 = vpop.permute.xlu1 %423  ;;  %v402_v27 = vpop.permute.xlu0 %401 }
  0xa8   : > { %v412_v54 = vsel %vm411_vm4, %v402_v27, %v404_v19  ;;  %v1106_v27 = vrot.slane %v2355_v28, 4 }
  0xa9   : > { %609 = vrot.lane.b32.xlu1 %v480_v46, %s1967_s12  ;;  %607 = vrot.lane.b32.xlu0 %v479_v47, %s1967_s12  ;;  %v644_v6 = vsel %vm642_vm6, %v2295_v5, %v412_v54  ;;  %v1090_v5 = vrot.slane %v2355_v28, 7 }
  0xab   : > { %v428_v30 = vpop.permute.xlu1 %427  ;;  %v426_v31 = vpop.permute.xlu0 %425 }
  0xac   : > { %v433_v37 = vsel %vm431_vm5, %v424_v26, %v426_v31  ;;  %v434_v47 = vsel %vm431_vm5, %v426_v31, %v428_v30 }
  0xad   : > { %1061 = vrot.lane.b32.xlu1 %v1057_v9, %s1953_s23  ;;  %601 = vrot.lane.b32.xlu0 %v476_v48, %s1967_s12  ;;  %v655_v46 = vsel %vm651_vm7, %v646_v39, %v433_v37  ;;  %v657_v61 = vsel %vm651_vm7, %v648_v52, %v434_v47 }
  0xaf   : > { %v422_v34 = vpop.permute.xlu1 %421  ;;  %v2368_v35 = vpop.permute.xlu0 %429 }
  0xb0   : > { %v435_v48 = vsel %vm431_vm5, %v428_v30, %v2368_v35  ;;  %v432_v62 = vsel %vm431_vm5, %v422_v34, %v424_v26  ;;  %v1107_v26 = vrot.slane %v2352_v11, 4 }
  0xb1   : > { %1065 = vrot.lane.b32.xlu1 %v1059_v8, %s1953_s23  ;;  %1063 = vrot.lane.b32.xlu0 %v1058_v32, %s1953_s23  ;;  %v659_v60 = vsel %vm651_vm7, %v650_v53, %v435_v48  ;;  %v653_v14 = vsel %vm651_vm7, %v644_v6, %v432_v62 }
  0xb3   : > { %v446_v40 = vpop.permute.xlu1 %445  ;;  %v444_v41 = vpop.permute.xlu0 %443 }
  0xb4   : > { %v453_v45 = vsel %vm451_vm8, %v444_v41, %v446_v40 }
  0xb5   : > { %1077 = vrot.lane.b32.xlu1 %v1073_v17, %s1954_s24  ;;  %1067 = vrot.lane.b32.xlu0 %v1060_v38, %s1953_s23  ;;  %v665_v49 = vsel %vm660_vm9, %v655_v46, %v453_v45 }
  0xb6   : > { %799 = vmatprep.subr.bf16.mxu0 %v665_v49 }
  0xb7   : > { %v2404_v55 = vpop.permute.xlu1 %449  ;;  %v448_v56 = vpop.permute.xlu0 %447 }
  0xb8   : > { %v454_v58 = vsel %vm451_vm8, %v446_v40, %v448_v56  ;;  %v455_v59 = vsel %vm451_vm8, %v448_v56, %v2404_v55  ;;  %v1122_v56 = vrot.slane %v2355_v28, 1 }
  0xb9   : > { %1081 = vrot.lane.b32.xlu1 %v1075_v42, %s1954_s24  ;;  %1079 = vrot.lane.b32.xlu0 %v1074_v50, %s1954_s24  ;;  %v671_v63 = vsel %vm660_vm9, %v659_v60, %v455_v59  ;;  %v668_v1 = vsel %vm660_vm9, %v657_v61, %v454_v58 }
  0xba   : > { %850 = vmatprep.subr.bf16.mxu1 %v671_v63  ;;  %v1137_v63 = vrot.slane %v2339_v24, 6 }
  0xbb   : > { %v464_v7 = vpop.permute.xlu1 %463  ;;  %851 = vmatpush1.bf16.msra.mxu1 %v668_v1  ;;  %v442_v10 = vpop.permute.xlu0 %441  ;;  %v1124_v1 = vrot.slane %v2366_v33, 1 }
  0xbc   : > { %v452_v13 = vsel %vm451_vm8, %v442_v10, %v444_v41  ;;  %v1108_v41 = vrot.slane %v2366_v33, 4  ;;  %v1139_v10 = vrot.slane %v2352_v11, 6 }
  0xbd   : > { %1093 = vrot.lane.b32.xlu1 %v1089_v57, %s1955_s25  ;;  %1083 = vrot.lane.b32.xlu0 %v1076_v4, %s1954_s24  ;;  %v662_v15 = vsel %vm660_vm9, %v653_v14, %v452_v13 }
  0xbe   : > { %800 = vmatpush1.bf16.msra.mxu0 %v662_v15 }
  0xbf   : > { %v468_v18 = vpop.permute.xlu1 %467  ;;  %v466_v19 = vpop.permute.xlu0 %465 }
  0xc0   : > { %v473_v3 = vsel %vm471_vm10, %v464_v7, %v466_v19  ;;  %v474_v37 = vsel %vm471_vm10, %v466_v19, %v468_v18  ;;  %v1140_v19 = vrot.slane %v2366_v33, 6 }
  0xc1   : > { %1097 = vrot.lane.b32.xlu1 %v1091_v16, %s1955_s25  ;;  %1095 = vrot.lane.b32.xlu0 %v1090_v5, %s1955_s25  ;;  %v677_v34 = vsel %vm673_vm11, %v453_v45, %v473_v3  ;;  %v1123_v45 = vrot.slane %v2352_v11, 1  ;;  %v679_v49 = vsel %vm673_vm11, %v454_v58, %v474_v37  ;;  %v3118_v37 = vrot.slane %v2366_v33, 3 }
  0xc3   : > { %v462_v23 = vpop.permute.xlu1 %461  ;;  %v2443_v25 = vpop.permute.xlu0 %469 }
  0xc4   : > { %v475_v39 = vsel %vm471_vm10, %v468_v18, %v2443_v25  ;;  %v472_v52 = vsel %vm471_vm10, %v462_v23, %v464_v7  ;;  %v1153_v18 = vrot.slane %v2339_v24, 3 }
  0xc5   : > { %1109 = vrot.lane.b32.xlu1 %v1105_v20, %s1956_s26  ;;  %1099 = vrot.lane.b32.xlu0 %v1092_v21, %s1955_s25  ;;  %v681_v48 = vsel %vm673_vm11, %v455_v59, %v475_v39  ;;  %v675_v61 = vsel %vm673_vm11, %v452_v13, %v472_v52  ;;  %v1138_v13 = vrot.slane %v2355_v28, 6 }
  0xc7   : > { %v486_v29 = vpop.permute.xlu1 %485  ;;  %v484_v30 = vpop.permute.xlu0 %483 }
  0xc8   : > { %v493_v31 = vsel %vm3117_vm12, %v484_v30, %v486_v29 }
  0xc9   : > { %1113 = vrot.lane.b32.xlu1 %v1107_v26, %s1956_s26  ;;  %1111 = vrot.lane.b32.xlu0 %v1106_v27, %s1956_s26  ;;  %v687_v40 = vsel %vm682_vm13, %v677_v34, %v493_v31 }
  0xca   : > { %801 = vmatprep.subr.bf16.mxu0 %v687_v40 }
  0xcb   : > { %v2468_v43 = vpop.permute.xlu1 %489  ;;  %v488_v44 = vpop.permute.xlu0 %487 }
  0xcc   : > { %v494_v46 = vsel %vm3117_vm12, %v486_v29, %v488_v44  ;;  %v495_v47 = vsel %vm3117_vm12, %v488_v44, %v2468_v43  ;;  %v1155_v29 = vrot.slane %v2352_v11, 3 }
  0xcd   : > { %1125 = vrot.lane.b32.xlu1 %v1121_v36, %s1957_s27  ;;  %1115 = vrot.lane.b32.xlu0 %v1108_v41, %s1956_s26  ;;  %v693_v53 = vsel %vm682_vm13, %v681_v48, %v495_v47  ;;  %v690_v54 = vsel %vm682_vm13, %v679_v49, %v494_v46 }
  0xce   : > { %852 = vmatprep.subr.bf16.mxu1 %v693_v53 }
  0xcf   : > { %v499_v59 = vpop.permute.xlu1 %498  ;;  %853 = vmatpush1.bf16.msra.mxu1 %v690_v54  ;;  %v482_v58 = vpop.permute.xlu0 %481 }
  0xd0   : > { %v492_v60 = vsel %vm3117_vm12, %v482_v58, %v484_v30  ;;  %v1154_v30 = vrot.slane %v2355_v28, 3  ;;  %vm3119_vm12 = vcmask 605184  }
  0xd1   : > { %1129 = vrot.lane.b32.xlu1 %v1123_v45, %s1957_s27  ;;  %1127 = vrot.lane.b32.xlu0 %v1122_v56, %s1957_s27  ;;  %v684_v62 = vsel %vm682_vm13, %v675_v61, %v492_v60 }
  0xd2   : > { %802 = vmatpush1.bf16.msra.mxu0 %v684_v62 }
  0xd3   : > { %v503_v6 = vpop.permute.xlu1 %502  ;;  %v501_v7 = vpop.permute.xlu0 %500 }
  0xd4   : > { %v508_v46 = vsel %vm3120_vm15, %v499_v59, %v501_v7  ;;  %v509_v61 = vsel %vm3120_vm15, %v501_v7, %v503_v6 }
  0xd5   : > { %1141 = vrot.lane.b32.xlu1 %v1137_v63, %s1958_s28  ;;  %1131 = vrot.lane.b32.xlu0 %v1124_v1, %s1957_s27 }
  0xd7   : > { %v514_v14 = vpop.permute.xlu1 %513  ;;  %v2505_v15 = vpop.permute.xlu0 %504 }
  0xd8   : > { %v510_v62 = vsel %vm3120_vm15, %v503_v6, %v2505_v15 }
  0xd9   : > { %1145 = vrot.lane.b32.xlu1 %v1139_v10, %s1958_s28  ;;  %1143 = vrot.lane.b32.xlu0 %v1138_v13, %s1958_s28 }
  0xdb   : > { %v518_v23 = vpop.permute.xlu1 %517  ;;  %v516_v3 = vpop.permute.xlu0 %515 }
  0xdc   : > { %v523_v44 = vsel %vm3121_vm14, %v514_v14, %v516_v3  ;;  %v524_v60 = vsel %vm3121_vm14, %v516_v3, %v518_v23 }
  0xdd   : > { %1157 = vrot.lane.b32.xlu1 %v1153_v18, %s1959_s29  ;;  %1147 = vrot.lane.b32.xlu0 %v1140_v19, %s1958_s28  ;;  %v700_v52 = vsel %vm616_vm2, %v508_v46, %v523_v44  ;;  %v703_v3 = vsel %vm616_vm2, %v509_v61, %v524_v60 }
  0xdf   : > { %v497_v31 = vpop.permute.xlu1 %496  ;;  %v2523_v34 = vpop.permute.xlu0 %519 }
  0xe0   : > { %v525_v53 = vsel %vm3121_vm14, %v518_v23, %v2523_v34  ;;  %v507_v44 = vsel %vm3120_vm15, %v497_v31, %v499_v59  ;;  %vm3123_vm15 = vcmask 408576  }
  0xe1   : > { %1161 = vrot.lane.b32.xlu1 %v1155_v29, %s1959_s29  ;;  %1159 = vrot.lane.b32.xlu0 %v1154_v30, %s1959_s29  ;;  %v706_v7 = vsel %vm616_vm2, %v510_v62, %v525_v53 }
  0xe3   : > { %v529_v39 = vpop.permute.xlu1 %528  ;;  %v512_v40 = vpop.permute.xlu0 %511 }
  0xe4   : > { %v522_v54 = vsel %vm3121_vm14, %v512_v40, %v514_v14  ;;  %vm3122_vm14 = vcmask 400384  }
  0xe5   : > { %1169 = vrot.lane.b32.xlu1 %v2339_v24, %s1960_s30  ;;  %1163 = vrot.lane.b32.xlu0 %v3118_v37, %s1959_s29  ;;  %v697_v23 = vsel %vm616_vm2, %v507_v44, %v522_v54 }
  0xe7   : > { %v533_v47 = vpop.permute.xlu1 %532  ;;  %v531_v48 = vpop.permute.xlu0 %530 }
  0xe8   : > { %v538_v49 = vsel %vm3119_vm12, %v529_v39, %v531_v48  ;;  %v539_v14 = vsel %vm3119_vm12, %v531_v48, %v533_v47 }
  0xe9   : > { %1173 = vrot.lane.b32.xlu1 %v2352_v11, %s1960_s30  ;;  %1171 = vrot.lane.b32.xlu0 %v2355_v28, %s1960_s30  ;;  %v711_v58 = vsel %vm629_vm3, %v700_v52, %v538_v49  ;;  %v714_v31 = vsel %vm629_vm3, %v703_v3, %v539_v14 }
  0xea   : > { %803 = vmatprep.subr.bf16.mxu0 %v711_v58 }
  0xeb   : > { %v527_v40 = vpop.permute.xlu1 %526  ;;  %v2555_v46 = vpop.permute.xlu0 %534 }
  0xec   : > { %v2558_v37 = vsel %vm3119_vm12, %v527_v40, %v529_v39  ;;  %v540_v52 = vsel %vm3119_vm12, %v533_v47, %v2555_v46  ;;  %vm551_vm12 = vcmask 596992  }
  0xed   : > { %1181 = vrot.lane.b32.xlu1 %v1057_v9, %s1961_s5  ;;  %1175 = vrot.lane.b32.xlu0 %v2366_v33, %s1960_s30  ;;  %v708_v59 = vsel %vm629_vm3, %v697_v23, %v2558_v37  ;;  %v717_v6 = vsel %vm629_vm3, %v706_v7, %v540_v52  ;;  %s1826_s30 = smul.u32 96, %s3156_s15 }
  0xee   : > { %804 = vmatpush1.bf16.msra.mxu0 %v708_v59  ;;  %854 = vmatprep.subr.bf16.mxu1 %v717_v6 }
  0xef   : > { %v546_v39 = vpop.permute.xlu1 %545  ;;  %855 = vmatpush1.bf16.msra.mxu1 %v714_v31  ;;  %v544_v47 = vpop.permute.xlu0 %543 }
  0xf1   : > { %1185 = vrot.lane.b32.xlu1 %v1059_v8, %s1961_s5  ;;  %1183 = vrot.lane.b32.xlu0 %v1058_v32, %s1961_s5 }
  0xf3   : > { %v2580_v9 = vpop.permute.xlu1 %549  ;;  %v548_v48 = vpop.permute.xlu0 %547 }
  0xf4   : > { %v554_v60 = vsel %vm551_vm12, %v546_v39, %v548_v48  ;;  %v555_v61 = vsel %vm551_vm12, %v548_v48, %v2580_v9 }
  0xf5   : > { %1193 = vrot.lane.b32.xlu1 %v1073_v17, %s1962_s6  ;;  %1187 = vrot.lane.b32.xlu0 %v1060_v38, %s1961_s5  ;;  %v726_v23 = vsel %vm642_vm6, %v540_v52, %v555_v61 }
  0xf7   : > { %v559_v53 = vpop.permute.xlu1 %558  ;;  %v542_v54 = vpop.permute.xlu0 %541 }
  0xf8   : > { %v552_v7 = vsel %vm551_vm12, %v542_v54, %v544_v47 }
  0xf9   : > { %1197 = vrot.lane.b32.xlu1 %v1075_v42, %s1962_s6  ;;  %1195 = vrot.lane.b32.xlu0 %v1074_v50, %s1962_s6  ;;  %v553_v42 = vsel %vm551_vm12, %v544_v47, %v546_v39  ;;  %v720_v47 = vsel %vm642_vm6, %v2558_v37, %v552_v7 }
  0xfa   : > { %v722_v50 = vsel %vm642_vm6, %v538_v49, %v553_v42  ;;  %v724_v49 = vsel %vm642_vm6, %v539_v14, %v554_v60 }
  0xfb   : > { %v563_v8 = vpop.permute.xlu1 %562  ;;  %v561_v32 = vpop.permute.xlu0 %560 }
  0xfc   : > { %v568_v58 = vsel %vm3123_vm15, %v559_v53, %v561_v32 }
  0xfd   : > { %1205 = vrot.lane.b32.xlu1 %v1089_v57, %s1963_s7  ;;  %1199 = vrot.lane.b32.xlu0 %v1076_v4, %s1962_s6  ;;  %v730_v44 = vsel %vm651_vm7, %v722_v50, %v568_v58  ;;  %s2985_s6 = scalar_lea.vmem %s3116_s4, %s1826_s30 }
  0xff   : > { %v557_v17 = vpop.permute.xlu1 %556  ;;  %v2600_v38 = vpop.permute.xlu0 %564 }
 0x100   : > { %v570_v40 = vsel %vm3123_vm15, %v563_v8, %v2600_v38  ;;  %v567_v39 = vsel %vm3123_vm15, %v557_v17, %v559_v53 }
 0x101   : > { %1209 = vrot.lane.b32.xlu1 %v1091_v16, %s1963_s7  ;;  %1207 = vrot.lane.b32.xlu0 %v1090_v5, %s1963_s7  ;;  %v569_v16 = vsel %vm3123_vm15, %v561_v32, %v563_v8  ;;  %v734_v31 = vsel %vm651_vm7, %v726_v23, %v570_v40  ;;  %v728_v8 = vsel %vm651_vm7, %v720_v47, %v567_v39  ;;  %vm611_vm15 = vcmask 384000  }
 0x103   : > { %v576_v57 = vpop.permute.xlu1 %575  ;;  %v574_v4 = vpop.permute.xlu0 %573 }
 0x104   : > { %v583_v62 = vsel %vm3122_vm14, %v574_v4, %v576_v57 }
 0x105   : > { %1217 = vrot.lane.b32.xlu1 %v1105_v20, %s1964_s8  ;;  %1211 = vrot.lane.b32.xlu0 %v1092_v21, %s1963_s7  ;;  %v739_v5 = vsel %vm660_vm9, %v730_v44, %v583_v62  ;;  %v732_v21 = vsel %vm651_vm7, %v724_v49, %v569_v16 }
 0x106   : > { %805 = vmatprep.subr.bf16.mxu0 %v739_v5 }
 0x107   : > { %v2629_v59 = vpop.permute.xlu1 %579  ;;  %v578_v6 = vpop.permute.xlu0 %577 }
 0x108   : > { %v584_v3 = vsel %vm3122_vm14, %v576_v57, %v578_v6  ;;  %v585_v20 = vsel %vm3122_vm14, %v578_v6, %v2629_v59  ;;  %v3125_v6 = vrot.slane %v2366_v33, 3 }
 0x109   : > { %1221 = vrot.lane.b32.xlu1 %v1107_v26, %s1964_s8  ;;  %1219 = vrot.lane.b32.xlu0 %v1106_v27, %s1964_s8  ;;  %v745_v14 = vsel %vm660_vm9, %v734_v31, %v585_v20  ;;  %v742_v52 = vsel %vm660_vm9, %v732_v21, %v584_v3  ;;  %v308_v31 = vld [vmem:[%s3115_s3 + $0x10] sm:$0xf] }
 0x10a   : > { %856 = vmatprep.subr.bf16.mxu1 %v745_v14 }
 0x10b   : > { %v589_v48 = vpop.permute.xlu1 %588  ;;  %857 = vmatpush1.bf16.msra.mxu1 %v742_v52  ;;  %v572_v54 = vpop.permute.xlu0 %571 }
 0x10c   : > { %v582_v53 = vsel %vm3122_vm14, %v572_v54, %v574_v4  ;;  %vm3124_vm14 = vcmask 392192  }
 0x10d   : > { %1229 = vrot.lane.b32.xlu1 %v1121_v36, %s1965_s9  ;;  %1223 = vrot.lane.b32.xlu0 %v1108_v41, %s1964_s8  ;;  %v736_v26 = vsel %vm660_vm9, %v728_v8, %v582_v53 }
 0x10e   : > { %806 = vmatpush1.bf16.msra.mxu0 %v736_v26 }
 0x10f   : > { %v593_v27 = vpop.permute.xlu1 %592  ;;  %v591_v37 = vpop.permute.xlu0 %590 }
 0x110   : > { %v598_v17 = vsel %vm3124_vm14, %v589_v48, %v591_v37  ;;  %v599_v58 = vsel %vm3124_vm14, %v591_v37, %v593_v27 }
 0x111   : > { %1233 = vrot.lane.b32.xlu1 %v1123_v45, %s1965_s9  ;;  %1231 = vrot.lane.b32.xlu0 %v1122_v56, %s1965_s9  ;;  %v750_v56 = vsel %vm673_vm11, %v583_v62, %v598_v17  ;;  %v752_v62 = vsel %vm673_vm11, %v584_v3, %v599_v58  ;;  %v307_v3 = vld [vmem:[%s3115_s3 + $0x8] sm:$0xff] }
 0x113   : > { %v587_v32 = vpop.permute.xlu1 %586  ;;  %v2662_v36 = vpop.permute.xlu0 %594 }
 0x114   : > { %v600_v50 = vsel %vm3124_vm14, %v593_v27, %v2662_v36 }
 0x115   : > { %1241 = vrot.lane.b32.xlu1 %v1137_v63, %s1966_s10  ;;  %1235 = vrot.lane.b32.xlu0 %v1124_v1, %s1965_s9  ;;  %v754_v61 = vsel %vm673_vm11, %v585_v20, %v600_v50 }
 0x117   : > { %v606_v41 = vpop.permute.xlu1 %605  ;;  %v604_v45 = vpop.permute.xlu0 %603 }
 0x118   : > { %v613_v42 = vsel %vm611_vm15, %v604_v45, %v606_v41 }
 0x119   : > { %1245 = vrot.lane.b32.xlu1 %v1139_v10, %s1966_s10  ;;  %1243 = vrot.lane.b32.xlu0 %v1138_v13, %s1966_s10  ;;  %v759_v63 = vsel %vm682_vm13, %v750_v56, %v613_v42  ;;  %v597_v10 = vsel %vm3124_vm14, %v587_v32, %v589_v48  ;;  %vm790_vm14 = vcmask 785408  }
 0x11a   : > { %807 = vmatprep.subr.bf16.mxu0 %v759_v63  ;;  %v748_v49 = vsel %vm673_vm11, %v582_v53, %v597_v10 }
 0x11b   : > { %v2683_v1 = vpop.permute.xlu1 %609  ;;  %v608_v57 = vpop.permute.xlu0 %607 }
 0x11c   : > { %v614_v4 = vsel %vm611_vm15, %v606_v41, %v608_v57  ;;  %v615_v60 = vsel %vm611_vm15, %v608_v57, %v2683_v1 }
 0x11d   : > { %1253 = vrot.lane.b32.xlu1 %v1153_v18, %s1967_s12  ;;  %1247 = vrot.lane.b32.xlu0 %v1140_v19, %s1966_s10  ;;  %v765_v13 = vsel %vm682_vm13, %v754_v61, %v615_v60  ;;  %v762_v44 = vsel %vm682_vm13, %v752_v62, %v614_v4  ;;  %v2704_v18 = vld [vmem:[%s3114_s2] sm:$0xff]  }
 0x11e   : > { %858 = vmatprep.subr.bf16.mxu1 %v765_v13 }
 0x11f   : > { %v1062_v16 = vpop.permute.xlu1 %1061  ;;  %859 = vmatpush1.bf16.msra.mxu1 %v762_v44  ;;  %v602_v40 = vpop.permute.xlu0 %601 }
 0x120   : > { %v612_v5 = vsel %vm611_vm15, %v602_v40, %v604_v45  ;;  %v1069_v39 = vsel %vm371_vm0, %v2257_v51, %v1062_v16 }
 0x121   : > { %1257 = vrot.lane.b32.xlu1 %v1155_v29, %s1967_s12  ;;  %1255 = vrot.lane.b32.xlu0 %v1154_v30, %s1967_s12  ;;  %v756_v19 = vsel %vm682_vm13, %v748_v49, %v612_v5  ;;  %v2725_v29 = vld [vmem:[%s3114_s2 + $0x8] ss:$0 sps:$4 sm:$0x33]   ;;  %v306_v30 = vld [vmem:[%s3115_s3] sm:$0xff]  ;;  %v1267_v53 = vsel %vm616_vm2, %v2042_v12, %v1069_v39 }
 0x122   : > { %808 = vmatpush1.bf16.msra.mxu0 %v756_v19  ;;  %1790 = vmatmul.mubr.msk.bf16.vlgmr.msra.gmra.mrb[0].mxu1 %vm790_vm14, %v2704_v18 }
 0x123   : > { %v1066_v23 = vpop.permute.xlu1 %1065  ;;  %v1064_v7 = vpop.permute.xlu0 %1063  ;;  %890 = vmatprep.mubr.bf16.mxu1 %v1952_v0 }
 0x124   : > { %v1070_v21 = vsel %vm371_vm0, %v1062_v16, %v1064_v7 }
 0x125   : > { %1259 = vrot.lane.b32.xlu0 %v3125_v6, %s1967_s12  ;;  %1788 = vmatmul.mubr.msk.bf16.vlgmr.msra.gmra.mrb[0].mxu0 %vm790_vm14, %v2704_v18  ;;  %v1270_v54 = vsel %vm616_vm2, %v2339_v24, %v1070_v21 }
 0x126   : > { %839 = vmatprep.mubr.bf16.mxu0 %v1952_v0  ;;  %769 = vperm.xlu1 %1868, %v306_v30  }
 0x127   : > { %v1078_v33 = vpop.permute.xlu1 %1077  ;;  %v1068_v20 = vpop.permute.xlu0 %1067 }
 0x128   : > { %v1085_v14 = vsel %vm391_vm1, %v2289_v2, %v1078_v33  ;;  %v1072_v51 = vsel %vm371_vm0, %v1066_v23, %v1068_v20  ;;  %v1071_v2 = vsel %vm371_vm0, %v1064_v7, %v1066_v23  ;;  %vm3126_vm0 = vcmask 809984  }
 0x129   : > { %774 = vperm.xlu0 %1869, %v307_v3   ;;  %v1278_v26 = vsel %vm629_vm3, %v1267_v53, %v1085_v14  ;;  %v1276_v32 = vsel %vm616_vm2, %v2352_v11, %v1072_v51  ;;  %v1273_v17 = vsel %vm616_vm2, %v2355_v28, %v1071_v2 }
 0x12a   : > { %1791 = vmatmul.mubr.msk.bf16.gmra.mrb[4].mxu1 %vm790_vm14, %v2725_v29  ;;  %779 = vperm.xlu1 %1868, %v308_v31  }
 0x12b   : > { %v1082_v52 = vpop.permute.xlu1 %1081  ;;  %v1080_v47 = vpop.permute.xlu0 %1079  ;;  %1492 = vmatprep.mubr.bf16.mxu1 %v1952_v0 }
 0x12c   : > { %v1086_v48 = vsel %vm391_vm1, %v1078_v33, %v1080_v47  ;;  %v1087_v27 = vsel %vm391_vm1, %v1080_v47, %v1082_v52 }
 0x12d   : > { %v1281_v8 = vsel %vm629_vm3, %v1270_v54, %v1086_v48  ;;  %1789 = vmatmul.mubr.msk.bf16.gmra.mrb[4].mxu0 %vm790_vm14, %v2725_v29  ;;  %v1284_v45 = vsel %vm629_vm3, %v1273_v17, %v1087_v27 }
 0x12e   : > { %1409 = vmatprep.subr.bf16.mxu0 %v1281_v8  ;;  %1441 = vmatprep.mubr.bf16.mxu0 %v1952_v0 }
 0x12f   : > { %v1094_v24 = vpop.permute.xlu1 %1093  ;;  %1410 = vmatpush1.bf16.msra.mxu0 %v1278_v26  ;;  %v1084_v37 = vpop.permute.xlu0 %1083 }
 0x130   : > { %v1088_v12 = vsel %vm391_vm1, %v1082_v52, %v1084_v37  ;;  %v1101_v11 = vsel %vm411_vm4, %v2328_v22, %v1094_v24  ;;  %vm3127_vm1 = vmmov %vm3126_vm0 }
 0x131   : > { %v1287_v41 = vsel %vm629_vm3, %v1276_v32, %v1088_v12  ;;  %v1290_v40 = vsel %vm642_vm6, %v1085_v14, %v1101_v11 }
 0x132   : > { %1460 = vmatprep.subr.bf16.mxu1 %v1287_v41 }
 0x133   : > { %v1098_v42 = vpop.permute.xlu1 %1097  ;;  %1461 = vmatpush1.bf16.msra.mxu1 %v1284_v45  ;;  %v1096_v56 = vpop.permute.xlu0 %1095 }
 0x134   : > { %v1102_v61 = vsel %vm411_vm4, %v1094_v24, %v1096_v56  ;;  %v1103_v19 = vsel %vm411_vm4, %v1096_v56, %v1098_v42 }
 0x135   : > { %v1292_v10 = vsel %vm642_vm6, %v1086_v48, %v1102_v61  ;;  %v1294_v31 = vsel %vm642_vm6, %v1087_v27, %v1103_v19 }
 0x137   : > { %v1110_v58 = vpop.permute.xlu1 %1109  ;;  %v1100_v50 = vpop.permute.xlu0 %1099 }
 0x138   : > { %v1117_v62 = vsel %vm431_vm5, %v2368_v35, %v1110_v58  ;;  %v1104_v5 = vsel %vm411_vm4, %v1098_v42, %v1100_v50  ;;  %vm3128_vm4 = vmmov %vm3126_vm0 }
 0x139   : > { %v1298_v23 = vsel %vm651_vm7, %v1290_v40, %v1117_v62  ;;  %v1296_v30 = vsel %vm642_vm6, %v1088_v12, %v1104_v5 }
 0x13b   : > { %v1114_v63 = vpop.permute.xlu1 %1113  ;;  %v1112_v57 = vpop.permute.xlu0 %1111 }
 0x13c   : > { %v1118_v28 = vsel %vm431_vm5, %v1110_v58, %v1112_v57 }
 0x13d   : > { %v1300_v22 = vsel %vm651_vm7, %v1292_v10, %v1118_v28 }
 0x13f   : > { %v1126_v4 = vpop.permute.xlu1 %1125  ;;  %v1116_v60 = vpop.permute.xlu0 %1115 }
 0x140   : > { %v1133_v13 = vsel %vm451_vm8, %v2404_v55, %v1126_v4  ;;  %v1120_v35 = vsel %vm431_vm5, %v1114_v63, %v1116_v60  ;;  %v1119_v55 = vsel %vm431_vm5, %v1112_v57, %v1114_v63  ;;  %vm3129_vm5 = vmmov %vm3126_vm0 }
 0x141   : > { %v1306_v6 = vsel %vm660_vm9, %v1298_v23, %v1133_v13  ;;  %v1304_v39 = vsel %vm651_vm7, %v1296_v30, %v1120_v35  ;;  %v1302_v14 = vsel %vm651_vm7, %v1294_v31, %v1119_v55 }
 0x143   : > { %v1130_v44 = vpop.permute.xlu1 %1129  ;;  %v1128_v16 = vpop.permute.xlu0 %1127 }
 0x144   : > { %v1134_v49 = vsel %vm451_vm8, %v1126_v4, %v1128_v16  ;;  %v1135_v3 = vsel %vm451_vm8, %v1128_v16, %v1130_v44 }
 0x145   : > { %v1309_v7 = vsel %vm660_vm9, %v1300_v22, %v1134_v49  ;;  %v1312_v47 = vsel %vm660_vm9, %v1302_v14, %v1135_v3 }
 0x146   : > { %1411 = vmatprep.subr.bf16.mxu0 %v1309_v7 }
 0x147   : > { %v1142_v33 = vpop.permute.xlu1 %1141  ;;  %1412 = vmatpush1.bf16.msra.mxu0 %v1306_v6  ;;  %v1132_v20 = vpop.permute.xlu0 %1131 }
 0x148   : > { %v1136_v21 = vsel %vm451_vm8, %v1130_v44, %v1132_v20  ;;  %v1149_v2 = vsel %vm471_vm10, %v2443_v25, %v1142_v33  ;;  %vm3130_vm8 = vcmask 613376  }
 0x149   : > { %v1315_v52 = vsel %vm660_vm9, %v1304_v39, %v1136_v21  ;;  %v1318_v32 = vsel %vm673_vm11, %v1133_v13, %v1149_v2 }
 0x14a   : > { %1462 = vmatprep.subr.bf16.mxu1 %v1315_v52 }
 0x14b   : > { %v1146_v48 = vpop.permute.xlu1 %1145  ;;  %1463 = vmatpush1.bf16.msra.mxu1 %v1312_v47  ;;  %v1144_v54 = vpop.permute.xlu0 %1143 }
 0x14c   : > { %v1150_v8 = vsel %vm471_vm10, %v1142_v33, %v1144_v54  ;;  %v1151_v45 = vsel %vm471_vm10, %v1144_v54, %v1146_v48 }
 0x14d   : > { %v1320_v12 = vsel %vm673_vm11, %v1134_v49, %v1150_v8  ;;  %v1322_v63 = vsel %vm673_vm11, %v1135_v3, %v1151_v45 }
 0x14f   : > { %v1158_v53 = vpop.permute.xlu1 %1157  ;;  %v1148_v51 = vpop.permute.xlu0 %1147 }
 0x150   : > { %v1165_v26 = vsel %vm3126_vm0, %v2468_v43, %v1158_v53  ;;  %v1152_v17 = vsel %vm471_vm10, %v1146_v48, %v1148_v51  ;;  %vm3131_vm10 = vmmov %vm3130_vm8  ;;  %vm3132_vm0 = vcmask 621568  }
 0x151   : > { %v1326_v25 = vsel %vm682_vm13, %v1318_v32, %v1165_v26  ;;  %v1324_v50 = vsel %vm673_vm11, %v1136_v21, %v1152_v17 }
 0x153   : > { %v1162_v27 = vpop.permute.xlu1 %1161  ;;  %v1160_v24 = vpop.permute.xlu0 %1159 }
 0x154   : > { %v1166_v37 = vsel %vm3127_vm1, %v1158_v53, %v1160_v24  ;;  %v1167_v42 = vsel %vm3128_vm4, %v1160_v24, %v1162_v27  ;;  %vm3133_vm1 = vcmask 605184   ;;  %vm3134_vm4 = vmmov %vm3132_vm0 }
 0x155   : > { %v1329_v41 = vsel %vm682_vm13, %v1320_v12, %v1166_v37  ;;  %v1332_v4 = vsel %vm682_vm13, %v1322_v63, %v1167_v42 }
 0x156   : > { %1413 = vmatprep.subr.bf16.mxu0 %v1329_v41 }
 0x157   : > { %v1170_v43 = vpop.permute.xlu1 %1169  ;;  %1414 = vmatpush1.bf16.msra.mxu0 %v1326_v25  ;;  %v1164_v56 = vpop.permute.xlu0 %1163 }
 0x158   : > { %v1168_v58 = vsel %vm3129_vm5, %v1162_v27, %v1164_v56  ;;  %v1177_v23 = vsel %vm3134_vm4, %v2505_v15, %v1170_v43  ;;  %vm3135_vm5 = vmmov %vm3133_vm1 }
 0x159   : > { %v1335_v57 = vsel %vm682_vm13, %v1324_v50, %v1168_v58  ;;  %vm3137_vm4 = vmmov %vm3132_vm0 }
 0x15a   : > { %1464 = vmatprep.subr.bf16.mxu1 %v1335_v57 }
 0x15b   : > { %v1174_v60 = vpop.permute.xlu1 %1173  ;;  %1465 = vmatpush1.bf16.msra.mxu1 %v1332_v4  ;;  %v1172_v61 = vpop.permute.xlu0 %1171 }
 0x15c   : > { %v1178_v5 = vsel %vm3132_vm0, %v1170_v43, %v1172_v61  ;;  %v1179_v31 = vsel %vm3137_vm4, %v1172_v61, %v1174_v60 }
 0x15f   : > { %v1182_v11 = vpop.permute.xlu1 %1181  ;;  %v1176_v28 = vpop.permute.xlu0 %1175 }
 0x160   : > { %v1189_v40 = vsel %vm3131_vm10, %v2523_v34, %v1182_v11  ;;  %vm3136_vm10 = vmmov %vm3130_vm8  ;;  %v1180_v3 = vsel %vm3132_vm0, %v1174_v60, %v1176_v28 }
 0x161   : > { %v1339_v55 = vsel %vm616_vm2, %v1177_v23, %v1189_v40 }
 0x163   : > { %v1186_v62 = vpop.permute.xlu1 %1185  ;;  %v1184_v10 = vpop.permute.xlu0 %1183 }
 0x164   : > { %v1190_v16 = vsel %vm3130_vm8, %v1182_v11, %v1184_v10  ;;  %v1191_v30 = vsel %vm3136_vm10, %v1184_v10, %v1186_v62 }
 0x165   : > { %v1342_v7 = vsel %vm616_vm2, %v1178_v5, %v1190_v16  ;;  %v1345_v14 = vsel %vm616_vm2, %v1179_v31, %v1191_v30 }
 0x167   : > { %v1194_v13 = vpop.permute.xlu1 %1193  ;;  %v1188_v44 = vpop.permute.xlu0 %1187 }
 0x168   : > { %v1201_v49 = vsel %vm3133_vm1, %v2555_v46, %v1194_v13  ;;  %v1192_v6 = vsel %vm3130_vm8, %v1186_v62, %v1188_v44 }
 0x169   : > { %v1350_v46 = vsel %vm629_vm3, %v1339_v55, %v1201_v49  ;;  %v1348_v39 = vsel %vm616_vm2, %v1180_v3, %v1192_v6  ;;  %vm3139_vm2 = vcmask 408576  }
 0x16a   : > { %vm3140_vm8 = vmmov %vm3139_vm2 }
 0x16b   : > { %v1198_v22 = vpop.permute.xlu1 %1197  ;;  %v1196_v19 = vpop.permute.xlu0 %1195  ;;  %vm3143_vm0 = vmmov %vm3139_vm2 }
 0x16c   : > { %v1202_v35 = vsel %vm3135_vm5, %v1194_v13, %v1196_v19  ;;  %v1203_v33 = vsel %vm3133_vm1, %v1196_v19, %v1198_v22  ;;  %vm3138_vm5 = vmmov %vm3133_vm1 }
 0x16d   : > { %v1353_v34 = vsel %vm629_vm3, %v1342_v7, %v1202_v35  ;;  %v1356_v47 = vsel %vm629_vm3, %v1345_v14, %v1203_v33  ;;  %vm3144_vm1 = vmmov %vm3143_vm0 }
 0x16e   : > { %1415 = vmatprep.subr.bf16.mxu0 %v1353_v34 }
 0x16f   : > { %v1206_v15 = vpop.permute.xlu1 %1205  ;;  %1416 = vmatpush1.bf16.msra.mxu0 %v1350_v46  ;;  %v1200_v20 = vpop.permute.xlu0 %1199 }
 0x170   : > { %v1204_v21 = vsel %vm3138_vm5, %v1198_v22, %v1200_v20  ;;  %v1213_v37 = vsel %vm551_vm12, %v2580_v9, %v1206_v15  ;;  %vm3147_vm5 = vcmask 392192  }
 0x171   : > { %v1359_v52 = vsel %vm629_vm3, %v1348_v39, %v1204_v21  ;;  %vm3141_vm3 = vcmask 400384   ;;  %v1362_v42 = vsel %vm642_vm6, %v1201_v49, %v1213_v37 }
 0x172   : > { %1466 = vmatprep.subr.bf16.mxu1 %v1359_v52  ;;  %vm3142_vm10 = vmmov %vm3141_vm3 }
 0x173   : > { %v1210_v48 = vpop.permute.xlu1 %1209  ;;  %1467 = vmatpush1.bf16.msra.mxu1 %v1356_v47  ;;  %v1208_v54 = vpop.permute.xlu0 %1207  ;;  %vm3145_vm4 = vmmov %vm3141_vm3 }
 0x174   : > { %v1214_v24 = vsel %vm551_vm12, %v1206_v15, %v1208_v54  ;;  %v1215_v58 = vsel %vm551_vm12, %v1208_v54, %v1210_v48 }
 0x175   : > { %v1364_v17 = vsel %vm642_vm6, %v1202_v35, %v1214_v24  ;;  %v1366_v28 = vsel %vm642_vm6, %v1203_v33, %v1215_v58 }
 0x177   : > { %v1218_v53 = vpop.permute.xlu1 %1217  ;;  %v1212_v51 = vpop.permute.xlu0 %1211 }
 0x178   : > { %v1225_v32 = vsel %vm3140_vm8, %v2600_v38, %v1218_v53  ;;  %v1216_v43 = vsel %vm551_vm12, %v1210_v48, %v1212_v51  ;;  %vm3146_vm12 = vmmov %vm3141_vm3 }
 0x179   : > { %v1370_v50 = vsel %vm651_vm7, %v1362_v42, %v1225_v32  ;;  %v1368_v4 = vsel %vm642_vm6, %v1204_v21, %v1216_v43  ;;  %vm3148_vm6 = vmmov %vm3147_vm5 }
 0x17b   : > { %v1222_v8 = vpop.permute.xlu1 %1221  ;;  %v1220_v2 = vpop.permute.xlu0 %1219 }
 0x17c   : > { %v1226_v12 = vsel %vm3139_vm2, %v1218_v53, %v1220_v2 }
 0x17d   : > { %v1372_v9 = vsel %vm651_vm7, %v1364_v17, %v1226_v12 }
 0x17f   : > { %v1230_v26 = vpop.permute.xlu1 %1229  ;;  %v1224_v27 = vpop.permute.xlu0 %1223 }
 0x180   : > { %v1237_v41 = vsel %vm3141_vm3, %v2629_v59, %v1230_v26  ;;  %v1228_v38 = vsel %vm3143_vm0, %v1222_v8, %v1224_v27  ;;  %v1227_v59 = vsel %vm3144_vm1, %v1220_v2, %v1222_v8 }
 0x181   : > { %v1378_v57 = vsel %vm660_vm9, %v1370_v50, %v1237_v41  ;;  %v1376_v10 = vsel %vm651_vm7, %v1368_v4, %v1228_v38  ;;  %v1374_v13 = vsel %vm651_vm7, %v1366_v28, %v1227_v59  ;;  %vm3149_vm7 = vmmov %vm3147_vm5 }
 0x183   : > { %v1234_v45 = vpop.permute.xlu1 %1233  ;;  %v1232_v25 = vpop.permute.xlu0 %1231 }
 0x184   : > { %v1238_v56 = vsel %vm3142_vm10, %v1230_v26, %v1232_v25  ;;  %v1239_v60 = vsel %vm3145_vm4, %v1232_v25, %v1234_v45 }
 0x185   : > { %v1381_v63 = vsel %vm660_vm9, %v1372_v9, %v1238_v56  ;;  %v1384_v16 = vsel %vm660_vm9, %v1374_v13, %v1239_v60 }
 0x186   : > { %1417 = vmatprep.subr.bf16.mxu0 %v1381_v63 }
 0x187   : > { %v1242_v61 = vpop.permute.xlu1 %1241  ;;  %1418 = vmatpush1.bf16.msra.mxu0 %v1378_v57  ;;  %v1236_v11 = vpop.permute.xlu0 %1235 }
 0x188   : > { %v1240_v62 = vsel %vm3146_vm12, %v1234_v45, %v1236_v11  ;;  %v1249_v23 = vsel %vm3148_vm6, %v2662_v36, %v1242_v61 }
 0x189   : > { %v1387_v44 = vsel %vm660_vm9, %v1376_v10, %v1240_v62  ;;  %v1390_v30 = vsel %vm673_vm11, %v1237_v41, %v1249_v23  ;;  %vm3150_vm9 = vmmov %vm3147_vm5 }
 0x18a   : > { %1468 = vmatprep.subr.bf16.mxu1 %v1387_v44 }
 0x18b   : > { %v1246_v40 = vpop.permute.xlu1 %1245  ;;  %1469 = vmatpush1.bf16.msra.mxu1 %v1384_v16  ;;  %v1244_v5 = vpop.permute.xlu0 %1243 }
 0x18c   : > { %v1250_v19 = vsel %vm3147_vm5, %v1242_v61, %v1244_v5  ;;  %v1251_v33 = vsel %vm3150_vm9, %v1244_v5, %v1246_v40 }
 0x18d   : > { %v1392_v34 = vsel %vm673_vm11, %v1238_v56, %v1250_v19  ;;  %v1394_v21 = vsel %vm673_vm11, %v1239_v60, %v1251_v33 }
 0x18f   : > { %v1254_v49 = vpop.permute.xlu1 %1253  ;;  %v1248_v22 = vpop.permute.xlu0 %1247 }
 0x190   : > { %v1261_v35 = vsel %vm611_vm15, %v2683_v1, %v1254_v49  ;;  %v1252_v46 = vsel %vm3149_vm7, %v1246_v40, %v1248_v22 }
 0x191   : > { %v1398_v36 = vsel %vm682_vm13, %v1390_v30, %v1261_v35  ;;  %v1396_v31 = vsel %vm673_vm11, %v1240_v62, %v1252_v46 }
 0x193   : > { %v1256_v7 = vpop.permute.xlu0 %1255  ;;  %v1258_v55 = vpop.permute.xlu1 %1257 }
 0x194   : > { %v1262_v6 = vsel %vm611_vm15, %v1254_v49, %v1256_v7  ;;  %v1263_v15 = vsel %vm611_vm15, %v1256_v7, %v1258_v55 }
 0x195   : > { %v1401_v3 = vsel %vm682_vm13, %v1392_v34, %v1262_v6  ;;  %v1404_v14 = vsel %vm682_vm13, %v1394_v21, %v1263_v15 }
 0x196   : > { %1419 = vmatprep.subr.bf16.mxu0 %v1401_v3 }
 0x197   : > { %1420 = vmatpush1.bf16.msra.mxu0 %v1398_v36  ;;  %v1260_v1 = vpop.permute.xlu0 %1259 }
 0x198   : > { %v1264_v20 = vsel %vm611_vm15, %v1258_v55, %v1260_v1 }
 0x199   : > { %v1407_v39 = vsel %vm682_vm13, %v1396_v31, %v1264_v20 }
 0x19a   : > { %1798 = vmatmul.mubr.msk.bf16.vlgmr.msra.gmra.mrb[8].mxu0 %vm790_vm14, %v2704_v18  ;;  %1470 = vmatprep.subr.bf16.mxu1 %v1407_v39 }
 0x19b   : > { %1471 = vmatpush1.bf16.msra.mxu1 %v1404_v14  ;;  %1451 = vmatprep.mubr.bf16.mxu0 %v1952_v0 }
 0x19e   : > { %1800 = vmatmul.mubr.msk.bf16.vlgmr.msra.gmra.mrb[8].mxu1 %vm790_vm14, %v2704_v18 }
 0x19f   : > { %1502 = vmatprep.mubr.bf16.mxu1 %v1952_v0 }
 0x1a2   : > { %1799 = vmatmul.mubr.msk.bf16.gmra.mrb[12].mxu0 %vm790_vm14, %v2725_v29 }
 0x1a5   : > { %v2887_v52 = vpop.permute.xlu1 %769 }
 0x1a6   : > { %1801 = vmatmul.mubr.msk.bf16.gmra.mrb[12].mxu1 %vm790_vm14, %v2725_v29 }
 0x1a8   : > { %v2889_v48 = vpop.permute.xlu0 %774 }
 0x1a9   : > { %v2942_v7 = vpop.permute.xlu1 %779 }
 0x1f5   : > { %v882_v47 = vpop.f32.mrb[0].mxu1 }
 0x1f6   : > { %v884_v54 = vpop.f32.mrb[1].mxu1  ;;  %v2892_v53 = vadd.f32 %v882_v47, %v2887_v52 }
 0x1f7   : > { %v886_v51 = vpop.f32.mrb[2].mxu1  ;;  %v2895_v18 = vadd.f32 %v884_v54, %v2887_v52 }
 0x1f8   : > { %v831_v0 = vpop.f32.mrb[0].mxu0  ;;  %v913_v8 = vmul.f32 %v2892_v53, %v2892_v53  ;;  %v888_v2 = vpop.f32.mrb[3].mxu1  ;;  %v2900_v29 = vadd.f32 %v886_v51, %v2889_v48 }
 0x1f9   : > { %v833_v26 = vpop.f32.mrb[1].mxu0  ;;  %v2903_v27 = vadd.f32 %v831_v0, %v2887_v52  ;;  %v914_v24 = vmul.f32 %v2895_v18, %v2895_v18  ;;  %v2918_v42 = vadd.f32 %v888_v2, %v2889_v48 }
 0x1fa   : > { %v835_v37 = vpop.f32.mrb[2].mxu0  ;;  %v2908_v12 = vadd.f32 %v833_v26, %v2887_v52  ;;  %v925_v32 = vmul.f32 %v913_v8, %v2892_v53  ;;  %v917_v58 = vmul.f32 %v2900_v29, %v2900_v29 }
 0x1fb   : > { %v911_v17 = vmul.f32 %v2903_v27, %v2903_v27  ;;  %v926_v41 = vmul.f32 %v914_v24, %v2895_v18  ;;  %v837_v45 = vpop.f32.mrb[3].mxu0  ;;  %v2915_v25 = vadd.f32 %v835_v37, %v2889_v48  ;;  %v918_v62 = vmul.f32 %v2918_v42, %v2918_v42 }
 0x1fc   : > { %v912_v43 = vmul.f32 %v2908_v12, %v2908_v12  ;;  %v937_v56 = vmul.f32 0.044715, %v925_v32  ;;  %v2923_v9 = vadd.f32 %v837_v45, %v2889_v48  ;;  %v929_v40 = vmul.f32 %v917_v58, %v2900_v29 }
 0x1fd   : > { %v923_v50 = vmul.f32 %v911_v17, %v2903_v27  ;;  %v938_v38 = vmul.f32 0.044715, %v926_v41  ;;  %v892_v63 = vpop.f32.mrb[4].mxu1  ;;  %v915_v4 = vmul.f32 %v2915_v25, %v2915_v25  ;;  %v930_v35 = vmul.f32 %v918_v62, %v2918_v42 }
 0x1fe   : > { %v924_v59 = vmul.f32 %v912_v43, %v2908_v12  ;;  %v949_v57 = vadd.f32 %v937_v56, %v2892_v53  ;;  %v894_v60 = vpop.f32.mrb[5].mxu1  ;;  %v916_v28 = vmul.f32 %v2923_v9, %v2923_v9  ;;  %v941_v30 = vmul.f32 0.044715, %v929_v40 }
 0x1ff   : > { %v935_v61 = vmul.f32 0.044715, %v923_v50  ;;  %v950_v11 = vadd.f32 %v938_v38, %v2895_v18  ;;  %v896_v10 = vpop.f32.mrb[6].mxu1  ;;  %v927_v16 = vmul.f32 %v915_v4, %v2915_v25  ;;  %v942_v36 = vmul.f32 0.044715, %v930_v35 }
 0x200   : > { %v936_v13 = vmul.f32 0.044715, %v924_v59  ;;  %v961_v44 = vmul.f32 0.7978846, %v949_v57  ;;  %v841_v5 = vpop.f32.mrb[4].mxu0  ;;  %v897_v49 = vpop.f32.mrb[7].mxu1  ;;  %v928_v23 = vmul.f32 %v916_v28, %v2923_v9  ;;  %v953_v20 = vadd.f32 %v941_v30, %v2900_v29 }
 0x201   : > { %v947_v22 = vadd.f32 %v935_v61, %v2903_v27  ;;  %v962_v19 = vmul.f32 0.7978846, %v950_v11  ;;  %v843_v55 = vpop.f32.mrb[5].mxu0  ;;  %v939_v34 = vmul.f32 0.044715, %v927_v16  ;;  %v2948_v31 = vadd.f32 %v841_v5, %v2942_v7 }
 0x202   : > { %v948_v6 = vadd.f32 %v936_v13, %v2908_v12  ;;  %1880 = vtanh.f32 %v961_v44  ;;  %v845_v46 = vpop.f32.mrb[6].mxu0  ;;  %v940_v33 = vmul.f32 0.044715, %v928_v23  ;;  %v954_v14 = vadd.f32 %v942_v36, %v2918_v42 }
 0x203   : > { %v959_v3 = vmul.f32 0.7978846, %v947_v22  ;;  %1882 = vtanh.f32 %v962_v19  ;;  %v951_v1 = vadd.f32 %v939_v34, %v2915_v25  ;;  %v846_v21 = vpop.f32.mrb[7].mxu0  ;;  %v2953_v47 = vadd.f32 %v892_v63, %v2942_v7 }
 0x204   : > { %v960_v15 = vmul.f32 0.7978846, %v948_v6  ;;  %v952_v39 = vadd.f32 %v940_v33, %v2923_v9  ;;  %v965_v51 = vmul.f32 0.7978846, %v953_v20  ;;  %v919_v0 = vmul.f32 %v2948_v31, %v2948_v31 }
 0x205   : > { %1884 = vtanh.f32 %v959_v3  ;;  %v963_v54 = vmul.f32 0.7978846, %v951_v1  ;;  %v966_v2 = vmul.f32 0.7978846, %v954_v14  ;;  %v921_v26 = vmul.f32 %v2953_v47, %v2953_v47 }
 0x206   : > { %1886 = vtanh.f32 %v960_v15  ;;  %v964_v8 = vmul.f32 0.7978846, %v952_v39  ;;  %v2960_v24 = vadd.f32 %v843_v55, %v2942_v7  ;;  %v931_v37 = vmul.f32 %v919_v0, %v2948_v31 }
 0x207   : > { %1888 = vtanh.f32 %v963_v54  ;;  %v2964_v32 = vadd.f32 %v894_v60, %v2942_v7  ;;  %v901_v43 = vmul.f32 0.5, %v2892_v53  ;;  %v933_v58 = vmul.f32 %v921_v26, %v2953_v47 }
 0x208   : > { %1890 = vtanh.f32 %v964_v8  ;;  %v920_v17 = vmul.f32 %v2960_v24, %v2960_v24  ;;  %v943_v41 = vmul.f32 0.044715, %v931_v37  ;;  %v902_v38 = vmul.f32 0.5, %v2895_v18 }
 0x209   : > { %1892 = vtanh.f32 %v965_v51  ;;  %v922_v45 = vmul.f32 %v2964_v32, %v2964_v32  ;;  %v945_v61 = vmul.f32 0.044715, %v933_v58  ;;  %v899_v11 = vmul.f32 0.5, %v2903_v27 }
 0x20a   : > { %1894 = vtanh.f32 %v966_v2  ;;  %v932_v56 = vmul.f32 %v920_v17, %v2960_v24  ;;  %v955_v63 = vadd.f32 %v943_v41, %v2948_v31  ;;  %v900_v13 = vmul.f32 0.5, %v2908_v12 }
 0x20b   : > { %v934_v59 = vmul.f32 %v922_v45, %v2964_v32  ;;  %v957_v16 = vadd.f32 %v945_v61, %v2953_v47  ;;  %v903_v12 = vmul.f32 0.5, %v2915_v25  ;;  %v904_v34 = vmul.f32 0.5, %v2923_v9 }
 0x20c   : > { %v1881_v50 = vpop.eup %1880  ;;  %v944_v60 = vmul.f32 0.044715, %v932_v56  ;;  %v967_v28 = vmul.f32 0.7978846, %v955_v63  ;;  %v905_v33 = vmul.f32 0.5, %v2900_v29  ;;  %v906_v1 = vmul.f32 0.5, %v2918_v42 }
 0x20d   : > { %v1883_v57 = vpop.eup %1882  ;;  %v985_v4 = vadd.f32 1.0, %v1881_v50  ;;  %v946_v62 = vmul.f32 0.044715, %v934_v59  ;;  %v969_v23 = vmul.f32 0.7978846, %v957_v16  ;;  %v907_v42 = vmul.f32 0.5, %v2948_v31 }
 0x20e   : > { %v986_v53 = vadd.f32 1.0, %v1883_v57  ;;  %v956_v18 = vadd.f32 %v944_v60, %v2960_v24  ;;  %1896 = vtanh.f32 %v967_v28  ;;  %v908_v37 = vmul.f32 0.5, %v2960_v24 }
 0x20f   : > { %v1885_v10 = vpop.eup %1884  ;;  %v997_v44 = vmul.f32 %v985_v4, %v901_v43  ;;  %v958_v22 = vadd.f32 %v946_v62, %v2964_v32  ;;  %v909_v41 = vmul.f32 0.5, %v2953_v47  ;;  %v910_v58 = vmul.f32 0.5, %v2964_v32 }
 0x210   : > { %v1887_v40 = vpop.eup %1886  ;;  %v983_v5 = vadd.f32 1.0, %v1885_v10  ;;  %v998_v49 = vmul.f32 %v986_v53, %v902_v38  ;;  %v968_v19 = vmul.f32 0.7978846, %v956_v18 }
 0x211   : > { %v984_v27 = vadd.f32 1.0, %v1887_v40  ;;  %v1889_v35 = vpop.eup %1888  ;;  %v970_v30 = vmul.f32 0.7978846, %v958_v22 }
 0x212   : > { %v995_v55 = vmul.f32 %v983_v5, %v899_v11  ;;  %v1813_v6 = vpack.c.bf16 %v998_v49, %v997_v44  ;;  %v1891_v46 = vpop.eup %1890  ;;  %v987_v36 = vadd.f32 1.0, %v1889_v35  ;;  %1898 = vtanh.f32 %v968_v19 }
 0x213   : > { %v996_v3 = vmul.f32 %v984_v27, %v900_v13  ;;  %v1893_v15 = vpop.eup %1892  ;;  %v988_v25 = vadd.f32 1.0, %v1891_v46  ;;  %1900 = vtanh.f32 %v969_v23 }
 0x214   : > { %1048 = vst [vmem:[%s2985_s6 + $0x8] sm:$0xff] %v1813_v6  ;;  %v1895_v20 = vpop.eup %1894  ;;  %v989_v39 = vadd.f32 1.0, %v1893_v15  ;;  %v999_v9 = vmul.f32 %v987_v36, %v903_v12  ;;  %1902 = vtanh.f32 %v970_v30 }
 0x215   : > { %v1812_v21 = vpack.c.bf16 %v996_v3, %v995_v55  ;;  %v990_v14 = vadd.f32 1.0, %v1895_v20  ;;  %v1000_v54 = vmul.f32 %v988_v25, %v904_v34 }
 0x216   : > { %v1001_v51 = vmul.f32 %v989_v39, %v905_v33 }
 0x217   : > { %1047 = vst [vmem:[%s2985_s6] sm:$0xff] %v1812_v21  ;;  %v1002_v29 = vmul.f32 %v990_v14, %v906_v1  ;;  %v1814_v0 = vpack.c.bf16 %v1000_v54, %v999_v9 }
 0x218   : > { %v1897_v8 = vpop.eup %1896 }
 0x219   : > { %v1815_v2 = vpack.c.bf16 %v1002_v29, %v1001_v51  ;;  %1049 = vst [vmem:[%s2985_s6 + $0x20] sm:$0xff] %v1814_v0  ;;  %v991_v26 = vadd.f32 1.0, %v1897_v8 }
 0x21b   : > { %1050 = vst [vmem:[%s2985_s6 + $0x28] sm:$0xff] %v1815_v2  ;;  %v1003_v56 = vmul.f32 %v991_v26, %v907_v42 }
 0x21c   : > { %v1899_v17 = vpop.eup %1898 }
 0x21d   : > { %v1901_v45 = vpop.eup %1900  ;;  %v992_v43 = vadd.f32 1.0, %v1899_v17 }
 0x21e   : > { %v1903_v50 = vpop.eup %1902  ;;  %v993_v38 = vadd.f32 1.0, %v1901_v45 }
 0x21f   : > { %v1004_v63 = vmul.f32 %v992_v43, %v908_v37  ;;  %v994_v59 = vadd.f32 1.0, %v1903_v50 }
 0x220   : > { %v1005_v57 = vmul.f32 %v993_v38, %v909_v41 }
 0x221   : > { %v1816_v31 = vpack.c.bf16 %v1004_v63, %v1003_v56  ;;  %v1006_v4 = vmul.f32 %v994_v59, %v910_v58 }
 0x223   : > { %1051 = vst [vmem:[%s2985_s6 + $0x40] sm:$0x33] %v1816_v31  ;;  %v1817_v60 = vpack.c.bf16 %v1006_v4, %v1005_v57 }
 0x225   : > { %1052 = vst [vmem:[%s2985_s6 + $0x48] sm:$0x33] %v1817_v60 }
 0x26d   : > { %v1443_v24 = vpop.f32.mrb[8].mxu0 }
 0x26e   : > { %v3002_v61 = vadd.f32 %v1443_v24, %v2887_v52  ;;  %v1445_v47 = vpop.f32.mrb[9].mxu0 }
 0x26f   : > { %v3005_v11 = vadd.f32 %v1445_v47, %v2887_v52  ;;  %v1447_v53 = vpop.f32.mrb[10].mxu0 }
 0x270   : > { %v1523_v32 = vmul.f32 %v3002_v61, %v3002_v61  ;;  %v3010_v28 = vadd.f32 %v1447_v53, %v2889_v48  ;;  %v1449_v62 = vpop.f32.mrb[11].mxu0 }
 0x271   : > { %v1524_v10 = vmul.f32 %v3005_v11, %v3005_v11  ;;  %v3015_v13 = vadd.f32 %v1449_v62, %v2889_v48  ;;  %v1494_v44 = vpop.f32.mrb[8].mxu1 }
 0x272   : > { %v1535_v18 = vmul.f32 %v1523_v32, %v3002_v61  ;;  %v1527_v16 = vmul.f32 %v3010_v28, %v3010_v28  ;;  %v3021_v40 = vadd.f32 %v1494_v44, %v2887_v52  ;;  %v1496_v5 = vpop.f32.mrb[9].mxu1  ;;  %v1512_v44 = vmul.f32 0.5, %v3005_v11 }
 0x273   : > { %v1536_v49 = vmul.f32 %v1524_v10, %v3005_v11  ;;  %v1528_v22 = vmul.f32 %v3015_v13, %v3015_v13  ;;  %v3027_v27 = vadd.f32 %v1496_v5, %v2887_v52  ;;  %v1498_v12 = vpop.f32.mrb[10].mxu1  ;;  %v1511_v10 = vmul.f32 0.5, %v3002_v61 }
 0x274   : > { %v1547_v19 = vmul.f32 0.044715, %v1535_v18  ;;  %v1539_v23 = vmul.f32 %v1527_v16, %v3010_v28  ;;  %v1525_v35 = vmul.f32 %v3021_v40, %v3021_v40  ;;  %v1500_v55 = vpop.f32.mrb[11].mxu1  ;;  %v3038_v36 = vadd.f32 %v1498_v12, %v2889_v48 }
 0x275   : > { %v1548_v6 = vmul.f32 0.044715, %v1536_v49  ;;  %v1540_v34 = vmul.f32 %v1528_v22, %v3015_v13  ;;  %v1526_v30 = vmul.f32 %v3027_v27, %v3027_v27  ;;  %v1453_v46 = vpop.f32.mrb[12].mxu0  ;;  %v3044_v54 = vadd.f32 %v1500_v55, %v2889_v48 }
 0x276   : > { %v1559_v3 = vadd.f32 %v1547_v19, %v3002_v61  ;;  %v1551_v33 = vmul.f32 0.044715, %v1539_v23  ;;  %v1537_v52 = vmul.f32 %v1525_v35, %v3021_v40  ;;  %v1455_v15 = vpop.f32.mrb[13].mxu0  ;;  %v1529_v2 = vmul.f32 %v3038_v36, %v3038_v36 }
 0x277   : > { %v1560_v1 = vadd.f32 %v1548_v6, %v3005_v11  ;;  %v1552_v25 = vmul.f32 0.044715, %v1540_v34  ;;  %v1538_v20 = vmul.f32 %v1526_v30, %v3027_v27  ;;  %v1457_v21 = vpop.f32.mrb[14].mxu0  ;;  %v1530_v58 = vmul.f32 %v3044_v54, %v3044_v54 }
 0x278   : > { %v1571_v39 = vmul.f32 0.7978846, %v1559_v3  ;;  %v1563_v9 = vadd.f32 %v1551_v33, %v3010_v28  ;;  %v1549_v14 = vmul.f32 0.044715, %v1537_v52  ;;  %v1458_v51 = vpop.f32.mrb[15].mxu0  ;;  %v1541_v48 = vmul.f32 %v1529_v2, %v3038_v36 }
 0x279   : > { %v1572_v29 = vmul.f32 0.7978846, %v1560_v1  ;;  %v1564_v0 = vadd.f32 %v1552_v25, %v3015_v13  ;;  %v1550_v8 = vmul.f32 0.044715, %v1538_v20  ;;  %v1504_v42 = vpop.f32.mrb[12].mxu1  ;;  %v3055_v50 = vadd.f32 %v1453_v46, %v2942_v7 }
 0x27a   : > { %1904 = vtanh.f32 %v1571_v39  ;;  %v1575_v26 = vmul.f32 0.7978846, %v1563_v9  ;;  %v1561_v37 = vadd.f32 %v1549_v14, %v3021_v40  ;;  %v1506_v17 = vpop.f32.mrb[13].mxu1  ;;  %v1553_v59 = vmul.f32 0.044715, %v1541_v48 }
 0x27b   : > { %1906 = vtanh.f32 %v1572_v29  ;;  %v1576_v41 = vmul.f32 0.7978846, %v1564_v0  ;;  %v1562_v45 = vadd.f32 %v1550_v8, %v3027_v27  ;;  %v1508_v43 = vpop.f32.mrb[14].mxu1  ;;  %v3058_v57 = vadd.f32 %v1455_v15, %v2942_v7 }
 0x27c   : > { %1908 = vtanh.f32 %v1575_v26  ;;  %v1573_v56 = vmul.f32 0.7978846, %v1561_v37  ;;  %v1509_v38 = vpop.f32.mrb[15].mxu1  ;;  %v1542_v31 = vmul.f32 %v1530_v58, %v3044_v54  ;;  %v1531_v4 = vmul.f32 %v3055_v50, %v3055_v50 }
 0x27d   : > { %1910 = vtanh.f32 %v1576_v41  ;;  %v1574_v63 = vmul.f32 0.7978846, %v1562_v45  ;;  %v1565_v60 = vadd.f32 %v1553_v59, %v3038_v36  ;;  %v1532_v24 = vmul.f32 %v3058_v57, %v3058_v57 }
 0x27e   : > { %1912 = vtanh.f32 %v1573_v56  ;;  %v1554_v47 = vmul.f32 0.044715, %v1542_v31  ;;  %v1543_v53 = vmul.f32 %v1531_v4, %v3055_v50  ;;  %v3068_v32 = vadd.f32 %v1504_v42, %v2942_v7 }
 0x27f   : > { %1914 = vtanh.f32 %v1574_v63  ;;  %v3071_v62 = vadd.f32 %v1506_v17, %v2942_v7  ;;  %v1577_v18 = vmul.f32 0.7978846, %v1565_v60  ;;  %v1544_v16 = vmul.f32 %v1532_v24, %v3058_v57 }
 0x280   : > { %v1515_v5 = vmul.f32 0.5, %v3010_v28  ;;  %v1566_v49 = vadd.f32 %v1554_v47, %v3044_v54  ;;  %v1555_v22 = vmul.f32 0.044715, %v1543_v53  ;;  %v1533_v12 = vmul.f32 %v3068_v32, %v3068_v32 }
 0x281   : > { %v1516_v19 = vmul.f32 0.5, %v3015_v13  ;;  %1916 = vtanh.f32 %v1577_v18  ;;  %v1556_v7 = vmul.f32 0.044715, %v1544_v16  ;;  %v1534_v61 = vmul.f32 %v3071_v62, %v3071_v62 }
 0x282   : > { %v1513_v11 = vmul.f32 0.5, %v3021_v40  ;;  %v1578_v35 = vmul.f32 0.7978846, %v1566_v49  ;;  %v1567_v55 = vadd.f32 %v1555_v22, %v3055_v50  ;;  %v1545_v28 = vmul.f32 %v1533_v12, %v3068_v32 }
 0x283   : > { %v1514_v30 = vmul.f32 0.5, %v3027_v27  ;;  %v1568_v46 = vadd.f32 %v1556_v7, %v3058_v57  ;;  %v1546_v13 = vmul.f32 %v1534_v61, %v3071_v62  ;;  %v1517_v38 = vmul.f32 0.5, %v3038_v36 }
 0x284   : > { %v1905_v23 = vpop.eup %1904  ;;  %1918 = vtanh.f32 %v1578_v35  ;;  %v1579_v52 = vmul.f32 0.7978846, %v1567_v55  ;;  %v1557_v15 = vmul.f32 0.044715, %v1545_v28  ;;  %v1518_v31 = vmul.f32 0.5, %v3044_v54 }
 0x285   : > { %v1907_v6 = vpop.eup %1906  ;;  %v1595_v34 = vadd.f32 1.0, %v1905_v23  ;;  %v1580_v20 = vmul.f32 0.7978846, %v1568_v46  ;;  %v1558_v21 = vmul.f32 0.044715, %v1546_v13  ;;  %v1519_v53 = vmul.f32 0.5, %v3055_v50 }
 0x286   : > { %v1909_v3 = vpop.eup %1908  ;;  %v1596_v33 = vadd.f32 1.0, %v1907_v6  ;;  %1920 = vtanh.f32 %v1579_v52  ;;  %v1569_v27 = vadd.f32 %v1557_v15, %v3068_v32  ;;  %v1521_v54 = vmul.f32 0.5, %v3068_v32 }
 0x287   : > { %v1911_v1 = vpop.eup %1910  ;;  %v1607_v40 = vmul.f32 %v1595_v34, %v1511_v10  ;;  %v1599_v25 = vadd.f32 1.0, %v1909_v3  ;;  %1922 = vtanh.f32 %v1580_v20  ;;  %v1570_v8 = vadd.f32 %v1558_v21, %v3071_v62 }
 0x288   : > { %v1913_v39 = vpop.eup %1912  ;;  %v1608_v9 = vmul.f32 %v1596_v33, %v1512_v44  ;;  %v1600_v14 = vadd.f32 1.0, %v1911_v1  ;;  %v1581_v37 = vmul.f32 0.7978846, %v1569_v27  ;;  %v1520_v44 = vmul.f32 0.5, %v3058_v57 }
 0x289   : > { %v1915_v51 = vpop.eup %1914  ;;  %v1611_v29 = vmul.f32 %v1599_v25, %v1515_v5  ;;  %v1597_v0 = vadd.f32 1.0, %v1913_v39  ;;  %v1582_v41 = vmul.f32 0.7978846, %v1570_v8  ;;  %v1522_v7 = vmul.f32 0.5, %v3071_v62 }
 0x28a   : > { %v1818_v2 = vpack.c.bf16 %v1608_v9, %v1607_v40  ;;  %v1612_v42 = vmul.f32 %v1600_v14, %v1516_v19  ;;  %v1598_v26 = vadd.f32 1.0, %v1915_v51  ;;  %1924 = vtanh.f32 %v1581_v37 }
 0x28b   : > { %v1609_v17 = vmul.f32 %v1597_v0, %v1513_v11  ;;  %v1917_v43 = vpop.eup %1916  ;;  %1926 = vtanh.f32 %v1582_v41 }
 0x28c   : > { %1659 = vst [vmem:[%s2985_s6 + $0x10] sm:$0xff] %v1818_v2  ;;  %v1820_v45 = vpack.c.bf16 %v1612_v42, %v1611_v29  ;;  %v1610_v48 = vmul.f32 %v1598_v26, %v1514_v30  ;;  %v1601_v58 = vadd.f32 1.0, %v1917_v43 }
 0x28e   : > { %1661 = vst [vmem:[%s2985_s6 + $0x30] sm:$0xff] %v1820_v45  ;;  %v1819_v56 = vpack.c.bf16 %v1610_v48, %v1609_v17  ;;  %v1919_v63 = vpop.eup %1918  ;;  %v1613_v59 = vmul.f32 %v1601_v58, %v1517_v38 }
 0x28f   : > { %v1602_v4 = vadd.f32 1.0, %v1919_v63 }
 0x290   : > { %1660 = vst [vmem:[%s2985_s6 + $0x18] sm:$0xff] %v1819_v56  ;;  %v1921_v60 = vpop.eup %1920 }
 0x291   : > { %v1923_v24 = vpop.eup %1922  ;;  %v1614_v47 = vmul.f32 %v1602_v4, %v1518_v31  ;;  %v1603_v10 = vadd.f32 1.0, %v1921_v60 }
 0x292   : > { %v1604_v18 = vadd.f32 1.0, %v1923_v24 }
 0x293   : > { %v1821_v16 = vpack.c.bf16 %v1614_v47, %v1613_v59  ;;  %v1615_v36 = vmul.f32 %v1603_v10, %v1519_v53 }
 0x294   : > { %v1925_v5 = vpop.eup %1924  ;;  %v1616_v49 = vmul.f32 %v1604_v18, %v1520_v44 }
 0x295   : > { %v1927_v22 = vpop.eup %1926  ;;  %1662 = vst [vmem:[%s2985_s6 + $0x38] sm:$0xff] %v1821_v16  ;;  %v1605_v12 = vadd.f32 1.0, %v1925_v5 }
 0x296   : > { %v1822_v19 = vpack.c.bf16 %v1616_v49, %v1615_v36  ;;  %v1606_v61 = vadd.f32 1.0, %v1927_v22 }
 0x297   : > { %v1617_v50 = vmul.f32 %v1605_v12, %v1521_v54 }
 0x298   : > { %1663 = vst [vmem:[%s2985_s6 + $0x50] sm:$0x33] %v1822_v19  ;;  %v1618_v23 = vmul.f32 %v1606_v61, %v1522_v7 }
 0x29a   : > { %v1823_v11 = vpack.c.bf16 %v1618_v23, %v1617_v50 }
 0x29c   : > { %1664 = vst [vmem:[%s2985_s6 + $0x58] sm:$0x33] %v1823_v11 }
 0x29d PF: > { %s14_s17 = sadd.s32 1, %s1950_s17   ;;  %s3151_s15 = smov %s1946_s16 }
 0x29e   : > { %p11_p5 = scmp.ge.s32.totalorder %s14_s17, 4   ;;  %s3152_s16 = smov %s3154_s18 }
 0x2a0   :  { %13 = sbr.rel (!%p11_p5) target bundleno = 2 (0x2), region = 69 }

</bundles_post_ra>
